<compile_context>
chip_gen: v7x
topology: tpu7x:2x2x1
jax: 0.10.0
libtpu: 0.0.40
codegen_flags: <defaults>
</compile_context>

<pallas_src>
import jax
import jax.numpy as jnp
from jax.experimental import pallas as pl
from jax.experimental.pallas import tpu as pltpu
import numpy as np

LANE = 128


def _round_up(x, m):
    return ((x + m - 1) // m) * m


# ----------------------------------------------------------------------------
# Pallas kernel: one Luong-dot GRU decoder step for the whole batch.
# ----------------------------------------------------------------------------
def luong_decoder_step_kernel(
    tok_ref,    # (B,)            int32 token ids (SMEM)
    h_ref,      # (B, HP)         previous hidden, zero-padded to HP lanes (f32)
    enc_ref,    # (B, S, HP)      encoder outputs, hidden dim zero-padded (bf16)
    emb_hbm,    # (VOCAB, F)      embedding table, left in HBM (f32, pl.ANY)
    wih_ref,    # (F, 3*HP)       GRU W_ih^T, gates r|z|n on 128-lane blocks (bf16)
    whh_ref,    # (HP, 3*HP)      GRU W_hh^T, same packing (bf16)
    bias_ref,   # (4, max(3HP,VP)) f32: b_ih | b_hh | combine bias | out bias(-1e30 pad)
    wch_ref,    # (HP, HP)        attention_combine weight^T, gru-out half (bf16)
    wcc_ref,    # (HP, HP)        attention_combine weight^T, context half (bf16)
    wo_ref,     # (HP, VP)        out weight^T (bf16)
    out_ref,    # (B, VP+HP+SP)   f32 output slab: [log_probs | new_hidden | attn]
    emb_buf,    # (B, F)          f32 VMEM scratch for gathered embedding rows
    sem,        # (B,)            DMA semaphores for the gather
):
    B, HP = h_ref.shape
    S = enc_ref.shape[1]
    G3 = wih_ref.shape[1]                    # 3 * HP
    VP = wo_ref.shape[1]

    # ---- In-kernel embedding gather: B overlapped row DMAs from HBM.
    # Token ids are read from SMEM before any wait (sst->sld forwarding).
    # Dropout(p=0.1) on the embedded input is identity in eval mode.
    copies = [
        pltpu.make_async_copy(emb_hbm.at[tok_ref[b]], emb_buf.at[b], sem.at[b])
        for b in range(B)
    ]
    for cp in copies:
        cp.start()
    for cp in copies:
        cp.wait()
    emb = emb_buf[...].astype(jnp.bfloat16)  # (B, F) — bf16 for the MXU

    h = h_ref[...]                           # (B, HP) f32; padded lanes are exactly 0

    # ---- GRU cell: 2 fused bf16 matmuls (f32 accumulation); gate slices land
    # on 128-lane vreg boundaries.
    gi = jnp.dot(emb, wih_ref[...], preferred_element_type=jnp.float32) \
        + bias_ref[0:1, 0:G3]
    gh = jnp.dot(h.astype(jnp.bfloat16), whh_ref[...],
                 preferred_element_type=jnp.float32) + bias_ref[1:2, 0:G3]
    r = jax.nn.sigmoid(gi[:, 0:HP] + gh[:, 0:HP])
    z = jax.nn.sigmoid(gi[:, HP:2 * HP] + gh[:, HP:2 * HP])
    n = jnp.tanh(gi[:, 2 * HP:3 * HP] + r * gh[:, 2 * HP:3 * HP])
    # Padded lanes: gi=gh=0 (zero weight columns / zero bias), so r=z=0.5, n=0,
    # h=0  ->  hnew padded lanes stay exactly 0.  Do NOT put nonzero bias there.
    hnew = (1.0 - z) * n + z * h             # (B, HP) f32, GRU output == new hidden

    # ---- Luong 'dot' attention (q = 1): VPU multiply + reductions; the MXU is
    # kept for the large projections.  Exact reciprocal so attn rows sum to 1.
    enc = enc_ref[...].astype(jnp.float32)                      # (B, S, HP)
    scores = jnp.sum(hnew[:, None, :] * enc, axis=-1)           # (B, S)
    m = jnp.max(scores, axis=-1, keepdims=True)
    e = jnp.exp(scores - m)
    attn = e / jnp.sum(e, axis=-1, keepdims=True)               # (B, S)
    context = jnp.sum(attn[:, :, None] * enc, axis=1)           # (B, HP)

    # ---- attention_combine without an in-kernel concatenate: two half matmuls.
    comb = jnp.tanh(
        jnp.dot(hnew.astype(jnp.bfloat16), wch_ref[...],
                preferred_element_type=jnp.float32)
        + jnp.dot(context.astype(jnp.bfloat16), wcc_ref[...],
                  preferred_element_type=jnp.float32)
        + bias_ref[2:3, 0:HP])                                  # (B, HP)

    # ---- Output projection + log_softmax in f32 (padded vocab lanes carry
    # a -1e30 f32 bias so they never win the max / contribute to the sum).
    logits = (jnp.dot(comb.astype(jnp.bfloat16), wo_ref[...],
                      preferred_element_type=jnp.float32)
              + bias_ref[3:4, 0:VP])                            # (B, VP)
    lmax = jnp.max(logits, axis=-1, keepdims=True)
    shifted = logits - lmax
    logp = shifted - jnp.log(jnp.sum(jnp.exp(shifted), axis=-1, keepdims=True))

    # ---- Direct lane-aligned stores into the output slab (no concat temps).
    out_ref[:, 0:VP] = logp
    out_ref[:, VP:VP + HP] = hnew
    out_ref[:, VP + HP:VP + HP + S] = attn   # one small masked store (S < 128)


# ----------------------------------------------------------------------------
# One-time prep (hoisted out of the decode loop) + jitted per-step wrapper.
# ----------------------------------------------------------------------------
def make_luong_decoder_step(params):
    """Packs/pads the PyTorch-layout weights once (bf16, 128-lane aligned) and
    returns a jitted single-step decoder:
        (input_step, hidden, enc_padded) -> (log_probs, hidden, attn)."""
    emb_f32 = jnp.asarray(params["embedding"], jnp.float32)  # (VOCAB, F)
    wih = jnp.asarray(params["gru_wih"], jnp.float32)        # (3H, F)
    whh = jnp.asarray(params["gru_whh"], jnp.float32)        # (3H, H)
    bih = jnp.asarray(params["gru_bih"], jnp.float32)        # (3H,)
    bhh = jnp.asarray(params["gru_bhh"], jnp.float32)        # (3H,)
    wc = jnp.asarray(params["comb_w"], jnp.float32)          # (H, 2H)
    bc = jnp.asarray(params["comb_b"], jnp.float32)          # (H,)
    wo = jnp.asarray(params["out_w"], jnp.float32)           # (V, H)
    bo = jnp.asarray(params["out_b"], jnp.float32)           # (V,)

    F = wih.shape[1]
    H = whh.shape[1]
    V = wo.shape[0]
    HP = _round_up(H, LANE)
    VP = _round_up(V, LANE)
    BW = max(3 * HP, VP)                                     # bias-slab width

    def pack_gates_t(w, rows):  # (3H, K) -> (rows, 3*HP); gate g at lanes [g*HP, g*HP+H)
        k = w.shape[1]
        out = jnp.zeros((rows, 3 * HP), jnp.float32)
        for g in range(3):
            out = out.at[0:k, g * HP:g * HP + H].set(w[g * H:(g + 1) * H, :].T)
        return out

    def pack_gate_bias(b):  # (3H,) -> (BW,), zeros on padded gate lanes (required!)
        out = jnp.zeros((BW,), jnp.float32)
        for g in range(3):
            out = out.at[g * HP:g * HP + H].set(b[g * H:(g + 1) * H])
        return out

    # bf16 weights (f32 accumulation in-kernel): halves per-step weight
    # HBM->VMEM traffic and VMEM residency, native MXU input width.
    wih_p = pack_gates_t(wih, F).astype(jnp.bfloat16)        # (F, 3*HP)
    whh_p = pack_gates_t(whh, HP).astype(jnp.bfloat16)       # (HP, 3*HP)
    wch_p = (jnp.zeros((HP, HP), jnp.float32)
             .at[0:H, 0:H].set(wc[:, 0:H].T)).astype(jnp.bfloat16)
    wcc_p = (jnp.zeros((HP, HP), jnp.float32)
             .at[0:H, 0:H].set(wc[:, H:2 * H].T)).astype(jnp.bfloat16)
    wo_p = (jnp.zeros((HP, VP), jnp.float32)
            .at[0:H, 0:V].set(wo.T)).astype(jnp.bfloat16)

    # Bias slab stays f32 (incl. the -1e30 padded-vocab bias and the log-softmax).
    bias = jnp.zeros((4, BW), jnp.float32)
    bias = bias.at[0, :].set(pack_gate_bias(bih))
    bias = bias.at[1, :].set(pack_gate_bias(bhh))
    bias = bias.at[2, 0:H].set(bc)
    bias = bias.at[3, 0:VP].set(jnp.full((VP,), -1e30, jnp.float32).at[0:V].set(bo))

    # TODO(synk): fuse the autoregressive decode loop into one pallas_call
    #   (grid=(T,), constant index_maps so weights/enc stay VMEM-resident,
    #   hidden carried in VMEM scratch, token ids via scalar prefetch). The
    #   module's forward is a single externally-driven step, so only that step
    #   is implemented here.
    # TODO(synk): at realistic V (>=32k), tile wo_p over VP with a grid axis
    #   (256-wide N tiles for v6e/v7x, marked 'parallel' so v7x splits it across
    #   its two TensorCores) plus an online log-softmax, and raise
    #   vmem_limit_bytes with headroom; unnecessary at these shapes.
    # TODO(synk): further weight quantization: int8 is valid on v5e/v6e MXUs,
    #   but v7x is fp8-only (use e4m3 there), so don't bake in int8.
    # TODO(synk): training-mode dropout and numLayers > 1 GRU stacks not implemented.

    vmem = pl.BlockSpec(memory_space=pltpu.MemorySpace.VMEM)
    smem = pl.BlockSpec(memory_space=pltpu.MemorySpace.SMEM)
    hbm = pl.BlockSpec(memory_space=pl.ANY)

    @jax.jit
    def step(input_step, hidden, enc_padded):
        """One decoder step.

        input_step: (B, 1) int32; hidden: (1, B, H) f32;
        enc_padded: (B, S, HP) bf16 from prepare_encoder_output().
        Caller contract: batch B >= 8 decode streams per call (ideally a
        multiple of 8) — smaller B wastes vreg sublanes / MXU rows and
        amortizes the per-step weight DMA over fewer tokens.
        """
        B, S, _ = enc_padded.shape
        SP = _round_up(S, LANE)
        tok = input_step[:, 0].astype(jnp.int32)                       # (B,)
        h_pad = jnp.pad(hidden[0].astype(jnp.float32), ((0, 0), (0, HP - H)))

        slab = pl.pallas_call(
            luong_decoder_step_kernel,
            out_shape=jax.ShapeDtypeStruct((B, VP + HP + SP), jnp.float32),
            in_specs=[smem, vmem, vmem, hbm, vmem, vmem, vmem, vmem, vmem, vmem],
            out_specs=vmem,
            scratch_shapes=[pltpu.VMEM((B, F), jnp.float32),
                            pltpu.SemaphoreType.DMA((B,))],
            compiler_params=pltpu.CompilerParams(
                vmem_limit_bytes=32 * 1024 * 1024),
        )(tok, h_pad, enc_padded, emb_f32, wih_p, whh_p, bias,
          wch_p, wcc_p, wo_p)

        # TODO(synk): for greedy decode, compute argmax over VP in-kernel and
        #   return only (token, hidden) to drop these per-step XLA slices.
        logp = slab[:, 0:V][:, None, :]                    # (B, 1, V)
        hnew = slab[:, VP:VP + H][None, :, :]              # (1, B, H)
        attn = slab[:, VP + HP:VP + HP + S][:, None, :]    # (B, 1, S)
        return logp, hnew, attn

    return step


def prepare_encoder_output(encoder_output, hidden_size):
    """Zero-pad the hidden dim to a 128-lane multiple and cast to bf16
    (done once per source sequence, not per decode step)."""
    enc = jnp.asarray(encoder_output, jnp.float32)
    pad = _round_up(hidden_size, LANE) - enc.shape[-1]
    enc = jnp.pad(enc, ((0, 0), (0, 0), (0, pad)))
    return enc.astype(jnp.bfloat16)


# ----------------------------------------------------------------------------
# Pure-JAX reference (mirrors the PyTorch Luong-dot forward, eval mode).
# ----------------------------------------------------------------------------
def reference_step(input_step, hidden, enc, p):
    H = hidden.shape[-1]
    emb = p["embedding"][input_step[:, 0]]                 # (B, F); dropout = identity
    h = hidden[0]                                          # (B, H)
    gi = emb @ p["gru_wih"].T + p["gru_bih"]
    gh = h @ p["gru_whh"].T + p["gru_bhh"]
    r = jax.nn.sigmoid(gi[:, :H] + gh[:, :H])
    z = jax.nn.sigmoid(gi[:, H:2 * H] + gh[:, H:2 * H])
    n = jnp.tanh(gi[:, 2 * H:] + r * gh[:, 2 * H:])
    hnew = (1.0 - z) * n + z * h                           # GRU output == new hidden (L=1)
    out = hnew[:, None, :]                                 # (B, 1, H)
    scores = jnp.sum(out * enc, axis=2)                    # (B, S)  Luong 'dot' score
    attn = jax.nn.softmax(scores, axis=1)[:, None, :]      # (B, 1, S)
    context = attn @ enc                                   # (B, 1, H)
    comb = jnp.concatenate([out, context], axis=-1) @ p["comb_w"].T + p["comb_b"]
    att_out = jnp.tanh(comb)
    logits = att_out @ p["out_w"].T + p["out_b"]
    return jax.nn.log_softmax(logits, axis=-1), hnew[None], attn


# ----------------------------------------------------------------------------
# Deterministic parameter init + run.
# ----------------------------------------------------------------------------
def make_params(key, vocab, feature_size, hidden_size, output_size):
    ks = jax.random.split(key, 9)
    u = lambda k, shape, s: jax.random.uniform(k, shape, jnp.float32, -s, s)
    F, H, V = feature_size, hidden_size, output_size
    return {
        "embedding": jax.random.normal(ks[0], (vocab, F), jnp.float32),
        "gru_wih": u(ks[1], (3 * H, F), 1.0 / np.sqrt(H)),
        "gru_whh": u(ks[2], (3 * H, H), 1.0 / np.sqrt(H)),
        "gru_bih": u(ks[3], (3 * H,), 1.0 / np.sqrt(H)),
        "gru_bhh": u(ks[4], (3 * H,), 1.0 / np.sqrt(H)),
        "comb_w": u(ks[5], (H, 2 * H), 1.0 / np.sqrt(2 * H)),
        "comb_b": u(ks[6], (H,), 1.0 / np.sqrt(2 * H)),
        "out_w": u(ks[7], (V, H), 1.0 / np.sqrt(H)),
        "out_b": u(ks[8], (V,), 1.0 / np.sqrt(H)),
    }


if __name__ == "__main__":
    B, S = 8, 8                          # batch (>= 8 streams), source seq length
    FEATURE, HIDDEN, OUTPUT, VOCAB = 32, 32, 64, 100

    key = jax.random.PRNGKey(0)
    kp, ki, kh, ke = jax.random.split(key, 4)
    params = make_params(kp, VOCAB, FEATURE, HIDDEN, OUTPUT)

    input_step = jax.random.randint(ki, (B, 1), 0, VOCAB, jnp.int32)     # (B, 1)
    hidden = jax.random.normal(kh, (1, B, HIDDEN), jnp.float32)           # (L=1, B, H)
    encoder_output = jax.random.normal(ke, (B, S, HIDDEN), jnp.float32)   # (B, S, H)

    # One-time prep (weight packing / bf16 cast), hoisted out of the decode loop.
    decoder_step = make_luong_decoder_step(params)
    enc_padded = prepare_encoder_output(encoder_output, HIDDEN)

    out, hnew, attn = decoder_step(input_step, hidden, enc_padded)
    jax.block_until_ready((out, hnew, attn))

    # Verify against a pure-JAX reference using the same bf16-rounded weights /
    # encoder outputs (the kernel stores weights in bf16 but accumulates in f32);
    # the tolerance absorbs the in-kernel bf16 activation casts.
    q = lambda x: jnp.asarray(x, jnp.bfloat16).astype(jnp.float32)
    params_q = {k: (q(v) if k in ("embedding", "gru_wih", "gru_whh",
                                  "comb_w", "out_w") else v)
                for k, v in params.items()}
    ro, rh, ra = reference_step(input_step, hidden, q(encoder_output), params_q)
    np.testing.assert_allclose(np.asarray(out), np.asarray(ro), rtol=5e-2, atol=5e-2)
    np.testing.assert_allclose(np.asarray(hnew), np.asarray(rh), rtol=5e-2, atol=5e-2)
    np.testing.assert_allclose(np.asarray(attn), np.asarray(ra), rtol=5e-2, atol=5e-2)

    assert out.shape == (B, 1, OUTPUT)
    assert hnew.shape == (1, B, HIDDEN)
    assert attn.shape == (B, 1, S)
    print("KERNEL_OK")
</pallas_src>

<mosaic_0001>
module attributes {stable_mosaic.version = 11 : i64} {
  func.func @luong_decoder_step_kernel(%arg0: memref<8xi32, #tpu.memory_space<smem>>, %arg1: memref<8x128xf32, #tpu.memory_space<vmem>>, %arg2: memref<8x8x128xbf16, #tpu.memory_space<vmem>>, %arg3: memref<100x32xf32, #tpu.memory_space<any>>, %arg4: memref<32x384xbf16, #tpu.memory_space<vmem>>, %arg5: memref<128x384xbf16, #tpu.memory_space<vmem>>, %arg6: memref<4x384xf32, #tpu.memory_space<vmem>>, %arg7: memref<128x128xbf16, #tpu.memory_space<vmem>>, %arg8: memref<128x128xbf16, #tpu.memory_space<vmem>>, %arg9: memref<128x128xbf16, #tpu.memory_space<vmem>>, %arg10: memref<8x384xf32, #tpu.memory_space<vmem>>, %arg11: memref<8x32xf32, #tpu.memory_space<vmem>>, %arg12: memref<8x!tpu.dma_semaphore, #tpu.memory_space<semaphore_mem>>) attributes {dimension_semantics = [], scalar_prefetch = 0 : i64, scratch_operands = 2 : i64, tpu.core_type = #tpu.core_type<tc>} {
    %c0 = arith.constant 0 : index
    %0 = memref.load %arg0[%c0] : memref<8xi32, #tpu.memory_space<smem>>
    %c1 = arith.constant 1 : index
    %1 = memref.load %arg0[%c1] : memref<8xi32, #tpu.memory_space<smem>>
    %c2 = arith.constant 2 : index
    %2 = memref.load %arg0[%c2] : memref<8xi32, #tpu.memory_space<smem>>
    %c3 = arith.constant 3 : index
    %3 = memref.load %arg0[%c3] : memref<8xi32, #tpu.memory_space<smem>>
    %c4 = arith.constant 4 : index
    %4 = memref.load %arg0[%c4] : memref<8xi32, #tpu.memory_space<smem>>
    %c5 = arith.constant 5 : index
    %5 = memref.load %arg0[%c5] : memref<8xi32, #tpu.memory_space<smem>>
    %c6 = arith.constant 6 : index
    %6 = memref.load %arg0[%c6] : memref<8xi32, #tpu.memory_space<smem>>
    %c7 = arith.constant 7 : index
    %7 = memref.load %arg0[%c7] : memref<8xi32, #tpu.memory_space<smem>>
    %c0_i32 = arith.constant 0 : i32
    %c0_i32_0 = arith.constant 0 : i32
    %c0_i32_1 = arith.constant 0 : i32
    %8 = tpu.memref_slice %arg3[%0, %c0_i32_1] : memref<100x32xf32, #tpu.memory_space<any>> -> memref<1x32xf32, #tpu.memory_space<any>>
    %9 = tpu.memref_squeeze %8 : memref<1x32xf32, #tpu.memory_space<any>> -> memref<32xf32, #tpu.memory_space<any>>
    %c0_i32_2 = arith.constant 0 : i32
    %10 = tpu.memref_slice %arg11[%c0_i32, %c0_i32_2] : memref<8x32xf32, #tpu.memory_space<vmem>> -> memref<1x32xf32, #tpu.memory_space<vmem>>
    %11 = tpu.memref_squeeze %10 : memref<1x32xf32, #tpu.memory_space<vmem>> -> memref<32xf32, #tpu.memory_space<vmem>>
    %12 = tpu.memref_slice %arg12[%c0_i32_0] : memref<8x!tpu.dma_semaphore, #tpu.memory_space<semaphore_mem>> -> memref<1x!tpu.dma_semaphore, #tpu.memory_space<semaphore_mem>>
    %13 = tpu.memref_squeeze %12 : memref<1x!tpu.dma_semaphore, #tpu.memory_space<semaphore_mem>> -> memref<!tpu.dma_semaphore, #tpu.memory_space<semaphore_mem>>
    tpu.enqueue_dma source(%9 : memref<32xf32, #tpu.memory_space<any>>) target(%11 : memref<32xf32, #tpu.memory_space<vmem>>) target_semaphore(%13 : memref<!tpu.dma_semaphore, #tpu.memory_space<semaphore_mem>>)
    %c1_i32 = arith.constant 1 : i32
    %c1_i32_3 = arith.constant 1 : i32
    %c0_i32_4 = arith.constant 0 : i32
    %14 = tpu.memref_slice %arg3[%1, %c0_i32_4] : memref<100x32xf32, #tpu.memory_space<any>> -> memref<1x32xf32, #tpu.memory_space<any>>
    %15 = tpu.memref_squeeze %14 : memref<1x32xf32, #tpu.memory_space<any>> -> memref<32xf32, #tpu.memory_space<any>>
    %c0_i32_5 = arith.constant 0 : i32
    %16 = tpu.memref_slice %arg11[%c1_i32, %c0_i32_5] : memref<8x32xf32, #tpu.memory_space<vmem>> -> memref<1x32xf32, #tpu.memory_space<vmem>>
    %17 = tpu.memref_squeeze %16 : memref<1x32xf32, #tpu.memory_space<vmem>> -> memref<32xf32, #tpu.memory_space<vmem>>
    %18 = tpu.memref_slice %arg12[%c1_i32_3] : memref<8x!tpu.dma_semaphore, #tpu.memory_space<semaphore_mem>> -> memref<1x!tpu.dma_semaphore, #tpu.memory_space<semaphore_mem>>
    %19 = tpu.memref_squeeze %18 : memref<1x!tpu.dma_semaphore, #tpu.memory_space<semaphore_mem>> -> memref<!tpu.dma_semaphore, #tpu.memory_space<semaphore_mem>>
    tpu.enqueue_dma source(%15 : memref<32xf32, #tpu.memory_space<any>>) target(%17 : memref<32xf32, #tpu.memory_space<vmem>>) target_semaphore(%19 : memref<!tpu.dma_semaphore, #tpu.memory_space<semaphore_mem>>)
    %c2_i32 = arith.constant 2 : i32
    %c2_i32_6 = arith.constant 2 : i32
    %c0_i32_7 = arith.constant 0 : i32
    %20 = tpu.memref_slice %arg3[%2, %c0_i32_7] : memref<100x32xf32, #tpu.memory_space<any>> -> memref<1x32xf32, #tpu.memory_space<any>>
    %21 = tpu.memref_squeeze %20 : memref<1x32xf32, #tpu.memory_space<any>> -> memref<32xf32, #tpu.memory_space<any>>
    %c0_i32_8 = arith.constant 0 : i32
    %22 = tpu.memref_slice %arg11[%c2_i32, %c0_i32_8] : memref<8x32xf32, #tpu.memory_space<vmem>> -> memref<1x32xf32, #tpu.memory_space<vmem>>
    %23 = tpu.memref_squeeze %22 : memref<1x32xf32, #tpu.memory_space<vmem>> -> memref<32xf32, #tpu.memory_space<vmem>>
    %24 = tpu.memref_slice %arg12[%c2_i32_6] : memref<8x!tpu.dma_semaphore, #tpu.memory_space<semaphore_mem>> -> memref<1x!tpu.dma_semaphore, #tpu.memory_space<semaphore_mem>>
    %25 = tpu.memref_squeeze %24 : memref<1x!tpu.dma_semaphore, #tpu.memory_space<semaphore_mem>> -> memref<!tpu.dma_semaphore, #tpu.memory_space<semaphore_mem>>
    tpu.enqueue_dma source(%21 : memref<32xf32, #tpu.memory_space<any>>) target(%23 : memref<32xf32, #tpu.memory_space<vmem>>) target_semaphore(%25 : memref<!tpu.dma_semaphore, #tpu.memory_space<semaphore_mem>>)
    %c3_i32 = arith.constant 3 : i32
    %c3_i32_9 = arith.constant 3 : i32
    %c0_i32_10 = arith.constant 0 : i32
    %26 = tpu.memref_slice %arg3[%3, %c0_i32_10] : memref<100x32xf32, #tpu.memory_space<any>> -> memref<1x32xf32, #tpu.memory_space<any>>
    %27 = tpu.memref_squeeze %26 : memref<1x32xf32, #tpu.memory_space<any>> -> memref<32xf32, #tpu.memory_space<any>>
    %c0_i32_11 = arith.constant 0 : i32
    %28 = tpu.memref_slice %arg11[%c3_i32, %c0_i32_11] : memref<8x32xf32, #tpu.memory_space<vmem>> -> memref<1x32xf32, #tpu.memory_space<vmem>>
    %29 = tpu.memref_squeeze %28 : memref<1x32xf32, #tpu.memory_space<vmem>> -> memref<32xf32, #tpu.memory_space<vmem>>
    %30 = tpu.memref_slice %arg12[%c3_i32_9] : memref<8x!tpu.dma_semaphore, #tpu.memory_space<semaphore_mem>> -> memref<1x!tpu.dma_semaphore, #tpu.memory_space<semaphore_mem>>
    %31 = tpu.memref_squeeze %30 : memref<1x!tpu.dma_semaphore, #tpu.memory_space<semaphore_mem>> -> memref<!tpu.dma_semaphore, #tpu.memory_space<semaphore_mem>>
    tpu.enqueue_dma source(%27 : memref<32xf32, #tpu.memory_space<any>>) target(%29 : memref<32xf32, #tpu.memory_space<vmem>>) target_semaphore(%31 : memref<!tpu.dma_semaphore, #tpu.memory_space<semaphore_mem>>)
    %c4_i32 = arith.constant 4 : i32
    %c4_i32_12 = arith.constant 4 : i32
    %c0_i32_13 = arith.constant 0 : i32
    %32 = tpu.memref_slice %arg3[%4, %c0_i32_13] : memref<100x32xf32, #tpu.memory_space<any>> -> memref<1x32xf32, #tpu.memory_space<any>>
    %33 = tpu.memref_squeeze %32 : memref<1x32xf32, #tpu.memory_space<any>> -> memref<32xf32, #tpu.memory_space<any>>
    %c0_i32_14 = arith.constant 0 : i32
    %34 = tpu.memref_slice %arg11[%c4_i32, %c0_i32_14] : memref<8x32xf32, #tpu.memory_space<vmem>> -> memref<1x32xf32, #tpu.memory_space<vmem>>
    %35 = tpu.memref_squeeze %34 : memref<1x32xf32, #tpu.memory_space<vmem>> -> memref<32xf32, #tpu.memory_space<vmem>>
    %36 = tpu.memref_slice %arg12[%c4_i32_12] : memref<8x!tpu.dma_semaphore, #tpu.memory_space<semaphore_mem>> -> memref<1x!tpu.dma_semaphore, #tpu.memory_space<semaphore_mem>>
    %37 = tpu.memref_squeeze %36 : memref<1x!tpu.dma_semaphore, #tpu.memory_space<semaphore_mem>> -> memref<!tpu.dma_semaphore, #tpu.memory_space<semaphore_mem>>
    tpu.enqueue_dma source(%33 : memref<32xf32, #tpu.memory_space<any>>) target(%35 : memref<32xf32, #tpu.memory_space<vmem>>) target_semaphore(%37 : memref<!tpu.dma_semaphore, #tpu.memory_space<semaphore_mem>>)
    %c5_i32 = arith.constant 5 : i32
    %c5_i32_15 = arith.constant 5 : i32
    %c0_i32_16 = arith.constant 0 : i32
    %38 = tpu.memref_slice %arg3[%5, %c0_i32_16] : memref<100x32xf32, #tpu.memory_space<any>> -> memref<1x32xf32, #tpu.memory_space<any>>
    %39 = tpu.memref_squeeze %38 : memref<1x32xf32, #tpu.memory_space<any>> -> memref<32xf32, #tpu.memory_space<any>>
    %c0_i32_17 = arith.constant 0 : i32
    %40 = tpu.memref_slice %arg11[%c5_i32, %c0_i32_17] : memref<8x32xf32, #tpu.memory_space<vmem>> -> memref<1x32xf32, #tpu.memory_space<vmem>>
    %41 = tpu.memref_squeeze %40 : memref<1x32xf32, #tpu.memory_space<vmem>> -> memref<32xf32, #tpu.memory_space<vmem>>
    %42 = tpu.memref_slice %arg12[%c5_i32_15] : memref<8x!tpu.dma_semaphore, #tpu.memory_space<semaphore_mem>> -> memref<1x!tpu.dma_semaphore, #tpu.memory_space<semaphore_mem>>
    %43 = tpu.memref_squeeze %42 : memref<1x!tpu.dma_semaphore, #tpu.memory_space<semaphore_mem>> -> memref<!tpu.dma_semaphore, #tpu.memory_space<semaphore_mem>>
    tpu.enqueue_dma source(%39 : memref<32xf32, #tpu.memory_space<any>>) target(%41 : memref<32xf32, #tpu.memory_space<vmem>>) target_semaphore(%43 : memref<!tpu.dma_semaphore, #tpu.memory_space<semaphore_mem>>)
    %c6_i32 = arith.constant 6 : i32
    %c6_i32_18 = arith.constant 6 : i32
    %c0_i32_19 = arith.constant 0 : i32
    %44 = tpu.memref_slice %arg3[%6, %c0_i32_19] : memref<100x32xf32, #tpu.memory_space<any>> -> memref<1x32xf32, #tpu.memory_space<any>>
    %45 = tpu.memref_squeeze %44 : memref<1x32xf32, #tpu.memory_space<any>> -> memref<32xf32, #tpu.memory_space<any>>
    %c0_i32_20 = arith.constant 0 : i32
    %46 = tpu.memref_slice %arg11[%c6_i32, %c0_i32_20] : memref<8x32xf32, #tpu.memory_space<vmem>> -> memref<1x32xf32, #tpu.memory_space<vmem>>
    %47 = tpu.memref_squeeze %46 : memref<1x32xf32, #tpu.memory_space<vmem>> -> memref<32xf32, #tpu.memory_space<vmem>>
    %48 = tpu.memref_slice %arg12[%c6_i32_18] : memref<8x!tpu.dma_semaphore, #tpu.memory_space<semaphore_mem>> -> memref<1x!tpu.dma_semaphore, #tpu.memory_space<semaphore_mem>>
    %49 = tpu.memref_squeeze %48 : memref<1x!tpu.dma_semaphore, #tpu.memory_space<semaphore_mem>> -> memref<!tpu.dma_semaphore, #tpu.memory_space<semaphore_mem>>
    tpu.enqueue_dma source(%45 : memref<32xf32, #tpu.memory_space<any>>) target(%47 : memref<32xf32, #tpu.memory_space<vmem>>) target_semaphore(%49 : memref<!tpu.dma_semaphore, #tpu.memory_space<semaphore_mem>>)
    %c7_i32 = arith.constant 7 : i32
    %c7_i32_21 = arith.constant 7 : i32
    %c0_i32_22 = arith.constant 0 : i32
    %50 = tpu.memref_slice %arg3[%7, %c0_i32_22] : memref<100x32xf32, #tpu.memory_space<any>> -> memref<1x32xf32, #tpu.memory_space<any>>
    %51 = tpu.memref_squeeze %50 : memref<1x32xf32, #tpu.memory_space<any>> -> memref<32xf32, #tpu.memory_space<any>>
    %c0_i32_23 = arith.constant 0 : i32
    %52 = tpu.memref_slice %arg11[%c7_i32, %c0_i32_23] : memref<8x32xf32, #tpu.memory_space<vmem>> -> memref<1x32xf32, #tpu.memory_space<vmem>>
    %53 = tpu.memref_squeeze %52 : memref<1x32xf32, #tpu.memory_space<vmem>> -> memref<32xf32, #tpu.memory_space<vmem>>
    %54 = tpu.memref_slice %arg12[%c7_i32_21] : memref<8x!tpu.dma_semaphore, #tpu.memory_space<semaphore_mem>> -> memref<1x!tpu.dma_semaphore, #tpu.memory_space<semaphore_mem>>
    %55 = tpu.memref_squeeze %54 : memref<1x!tpu.dma_semaphore, #tpu.memory_space<semaphore_mem>> -> memref<!tpu.dma_semaphore, #tpu.memory_space<semaphore_mem>>
    tpu.enqueue_dma source(%51 : memref<32xf32, #tpu.memory_space<any>>) target(%53 : memref<32xf32, #tpu.memory_space<vmem>>) target_semaphore(%55 : memref<!tpu.dma_semaphore, #tpu.memory_space<semaphore_mem>>)
    %c0_i32_24 = arith.constant 0 : i32
    %c0_i32_25 = arith.constant 0 : i32
    %c0_i32_26 = arith.constant 0 : i32
    %56 = tpu.memref_slice %arg3[%0, %c0_i32_26] : memref<100x32xf32, #tpu.memory_space<any>> -> memref<1x32xf32, #tpu.memory_space<any>>
    %57 = tpu.memref_squeeze %56 : memref<1x32xf32, #tpu.memory_space<any>> -> memref<32xf32, #tpu.memory_space<any>>
    %c0_i32_27 = arith.constant 0 : i32
    %58 = tpu.memref_slice %arg11[%c0_i32_24, %c0_i32_27] : memref<8x32xf32, #tpu.memory_space<vmem>> -> memref<1x32xf32, #tpu.memory_space<vmem>>
    %59 = tpu.memref_squeeze %58 : memref<1x32xf32, #tpu.memory_space<vmem>> -> memref<32xf32, #tpu.memory_space<vmem>>
    %60 = tpu.memref_slice %arg12[%c0_i32_25] : memref<8x!tpu.dma_semaphore, #tpu.memory_space<semaphore_mem>> -> memref<1x!tpu.dma_semaphore, #tpu.memory_space<semaphore_mem>>
    %61 = tpu.memref_squeeze %60 : memref<1x!tpu.dma_semaphore, #tpu.memory_space<semaphore_mem>> -> memref<!tpu.dma_semaphore, #tpu.memory_space<semaphore_mem>>
    tpu.wait_dma2 semaphore(%61 : memref<!tpu.dma_semaphore, #tpu.memory_space<semaphore_mem>>) src(%57 : memref<32xf32, #tpu.memory_space<any>>) dst(%59 : memref<32xf32, #tpu.memory_space<vmem>>)
    %c1_i32_28 = arith.constant 1 : i32
    %c1_i32_29 = arith.constant 1 : i32
    %c0_i32_30 = arith.constant 0 : i32
    %62 = tpu.memref_slice %arg3[%1, %c0_i32_30] : memref<100x32xf32, #tpu.memory_space<any>> -> memref<1x32xf32, #tpu.memory_space<any>>
    %63 = tpu.memref_squeeze %62 : memref<1x32xf32, #tpu.memory_space<any>> -> memref<32xf32, #tpu.memory_space<any>>
    %c0_i32_31 = arith.constant 0 : i32
    %64 = tpu.memref_slice %arg11[%c1_i32_28, %c0_i32_31] : memref<8x32xf32, #tpu.memory_space<vmem>> -> memref<1x32xf32, #tpu.memory_space<vmem>>
    %65 = tpu.memref_squeeze %64 : memref<1x32xf32, #tpu.memory_space<vmem>> -> memref<32xf32, #tpu.memory_space<vmem>>
    %66 = tpu.memref_slice %arg12[%c1_i32_29] : memref<8x!tpu.dma_semaphore, #tpu.memory_space<semaphore_mem>> -> memref<1x!tpu.dma_semaphore, #tpu.memory_space<semaphore_mem>>
    %67 = tpu.memref_squeeze %66 : memref<1x!tpu.dma_semaphore, #tpu.memory_space<semaphore_mem>> -> memref<!tpu.dma_semaphore, #tpu.memory_space<semaphore_mem>>
    tpu.wait_dma2 semaphore(%67 : memref<!tpu.dma_semaphore, #tpu.memory_space<semaphore_mem>>) src(%63 : memref<32xf32, #tpu.memory_space<any>>) dst(%65 : memref<32xf32, #tpu.memory_space<vmem>>)
    %c2_i32_32 = arith.constant 2 : i32
    %c2_i32_33 = arith.constant 2 : i32
    %c0_i32_34 = arith.constant 0 : i32
    %68 = tpu.memref_slice %arg3[%2, %c0_i32_34] : memref<100x32xf32, #tpu.memory_space<any>> -> memref<1x32xf32, #tpu.memory_space<any>>
    %69 = tpu.memref_squeeze %68 : memref<1x32xf32, #tpu.memory_space<any>> -> memref<32xf32, #tpu.memory_space<any>>
    %c0_i32_35 = arith.constant 0 : i32
    %70 = tpu.memref_slice %arg11[%c2_i32_32, %c0_i32_35] : memref<8x32xf32, #tpu.memory_space<vmem>> -> memref<1x32xf32, #tpu.memory_space<vmem>>
    %71 = tpu.memref_squeeze %70 : memref<1x32xf32, #tpu.memory_space<vmem>> -> memref<32xf32, #tpu.memory_space<vmem>>
    %72 = tpu.memref_slice %arg12[%c2_i32_33] : memref<8x!tpu.dma_semaphore, #tpu.memory_space<semaphore_mem>> -> memref<1x!tpu.dma_semaphore, #tpu.memory_space<semaphore_mem>>
    %73 = tpu.memref_squeeze %72 : memref<1x!tpu.dma_semaphore, #tpu.memory_space<semaphore_mem>> -> memref<!tpu.dma_semaphore, #tpu.memory_space<semaphore_mem>>
    tpu.wait_dma2 semaphore(%73 : memref<!tpu.dma_semaphore, #tpu.memory_space<semaphore_mem>>) src(%69 : memref<32xf32, #tpu.memory_space<any>>) dst(%71 : memref<32xf32, #tpu.memory_space<vmem>>)
    %c3_i32_36 = arith.constant 3 : i32
    %c3_i32_37 = arith.constant 3 : i32
    %c0_i32_38 = arith.constant 0 : i32
    %74 = tpu.memref_slice %arg3[%3, %c0_i32_38] : memref<100x32xf32, #tpu.memory_space<any>> -> memref<1x32xf32, #tpu.memory_space<any>>
    %75 = tpu.memref_squeeze %74 : memref<1x32xf32, #tpu.memory_space<any>> -> memref<32xf32, #tpu.memory_space<any>>
    %c0_i32_39 = arith.constant 0 : i32
    %76 = tpu.memref_slice %arg11[%c3_i32_36, %c0_i32_39] : memref<8x32xf32, #tpu.memory_space<vmem>> -> memref<1x32xf32, #tpu.memory_space<vmem>>
    %77 = tpu.memref_squeeze %76 : memref<1x32xf32, #tpu.memory_space<vmem>> -> memref<32xf32, #tpu.memory_space<vmem>>
    %78 = tpu.memref_slice %arg12[%c3_i32_37] : memref<8x!tpu.dma_semaphore, #tpu.memory_space<semaphore_mem>> -> memref<1x!tpu.dma_semaphore, #tpu.memory_space<semaphore_mem>>
    %79 = tpu.memref_squeeze %78 : memref<1x!tpu.dma_semaphore, #tpu.memory_space<semaphore_mem>> -> memref<!tpu.dma_semaphore, #tpu.memory_space<semaphore_mem>>
    tpu.wait_dma2 semaphore(%79 : memref<!tpu.dma_semaphore, #tpu.memory_space<semaphore_mem>>) src(%75 : memref<32xf32, #tpu.memory_space<any>>) dst(%77 : memref<32xf32, #tpu.memory_space<vmem>>)
    %c4_i32_40 = arith.constant 4 : i32
    %c4_i32_41 = arith.constant 4 : i32
    %c0_i32_42 = arith.constant 0 : i32
    %80 = tpu.memref_slice %arg3[%4, %c0_i32_42] : memref<100x32xf32, #tpu.memory_space<any>> -> memref<1x32xf32, #tpu.memory_space<any>>
    %81 = tpu.memref_squeeze %80 : memref<1x32xf32, #tpu.memory_space<any>> -> memref<32xf32, #tpu.memory_space<any>>
    %c0_i32_43 = arith.constant 0 : i32
    %82 = tpu.memref_slice %arg11[%c4_i32_40, %c0_i32_43] : memref<8x32xf32, #tpu.memory_space<vmem>> -> memref<1x32xf32, #tpu.memory_space<vmem>>
    %83 = tpu.memref_squeeze %82 : memref<1x32xf32, #tpu.memory_space<vmem>> -> memref<32xf32, #tpu.memory_space<vmem>>
    %84 = tpu.memref_slice %arg12[%c4_i32_41] : memref<8x!tpu.dma_semaphore, #tpu.memory_space<semaphore_mem>> -> memref<1x!tpu.dma_semaphore, #tpu.memory_space<semaphore_mem>>
    %85 = tpu.memref_squeeze %84 : memref<1x!tpu.dma_semaphore, #tpu.memory_space<semaphore_mem>> -> memref<!tpu.dma_semaphore, #tpu.memory_space<semaphore_mem>>
    tpu.wait_dma2 semaphore(%85 : memref<!tpu.dma_semaphore, #tpu.memory_space<semaphore_mem>>) src(%81 : memref<32xf32, #tpu.memory_space<any>>) dst(%83 : memref<32xf32, #tpu.memory_space<vmem>>)
    %c5_i32_44 = arith.constant 5 : i32
    %c5_i32_45 = arith.constant 5 : i32
    %c0_i32_46 = arith.constant 0 : i32
    %86 = tpu.memref_slice %arg3[%5, %c0_i32_46] : memref<100x32xf32, #tpu.memory_space<any>> -> memref<1x32xf32, #tpu.memory_space<any>>
    %87 = tpu.memref_squeeze %86 : memref<1x32xf32, #tpu.memory_space<any>> -> memref<32xf32, #tpu.memory_space<any>>
    %c0_i32_47 = arith.constant 0 : i32
    %88 = tpu.memref_slice %arg11[%c5_i32_44, %c0_i32_47] : memref<8x32xf32, #tpu.memory_space<vmem>> -> memref<1x32xf32, #tpu.memory_space<vmem>>
    %89 = tpu.memref_squeeze %88 : memref<1x32xf32, #tpu.memory_space<vmem>> -> memref<32xf32, #tpu.memory_space<vmem>>
    %90 = tpu.memref_slice %arg12[%c5_i32_45] : memref<8x!tpu.dma_semaphore, #tpu.memory_space<semaphore_mem>> -> memref<1x!tpu.dma_semaphore, #tpu.memory_space<semaphore_mem>>
    %91 = tpu.memref_squeeze %90 : memref<1x!tpu.dma_semaphore, #tpu.memory_space<semaphore_mem>> -> memref<!tpu.dma_semaphore, #tpu.memory_space<semaphore_mem>>
    tpu.wait_dma2 semaphore(%91 : memref<!tpu.dma_semaphore, #tpu.memory_space<semaphore_mem>>) src(%87 : memref<32xf32, #tpu.memory_space<any>>) dst(%89 : memref<32xf32, #tpu.memory_space<vmem>>)
    %c6_i32_48 = arith.constant 6 : i32
    %c6_i32_49 = arith.constant 6 : i32
    %c0_i32_50 = arith.constant 0 : i32
    %92 = tpu.memref_slice %arg3[%6, %c0_i32_50] : memref<100x32xf32, #tpu.memory_space<any>> -> memref<1x32xf32, #tpu.memory_space<any>>
    %93 = tpu.memref_squeeze %92 : memref<1x32xf32, #tpu.memory_space<any>> -> memref<32xf32, #tpu.memory_space<any>>
    %c0_i32_51 = arith.constant 0 : i32
    %94 = tpu.memref_slice %arg11[%c6_i32_48, %c0_i32_51] : memref<8x32xf32, #tpu.memory_space<vmem>> -> memref<1x32xf32, #tpu.memory_space<vmem>>
    %95 = tpu.memref_squeeze %94 : memref<1x32xf32, #tpu.memory_space<vmem>> -> memref<32xf32, #tpu.memory_space<vmem>>
    %96 = tpu.memref_slice %arg12[%c6_i32_49] : memref<8x!tpu.dma_semaphore, #tpu.memory_space<semaphore_mem>> -> memref<1x!tpu.dma_semaphore, #tpu.memory_space<semaphore_mem>>
    %97 = tpu.memref_squeeze %96 : memref<1x!tpu.dma_semaphore, #tpu.memory_space<semaphore_mem>> -> memref<!tpu.dma_semaphore, #tpu.memory_space<semaphore_mem>>
    tpu.wait_dma2 semaphore(%97 : memref<!tpu.dma_semaphore, #tpu.memory_space<semaphore_mem>>) src(%93 : memref<32xf32, #tpu.memory_space<any>>) dst(%95 : memref<32xf32, #tpu.memory_space<vmem>>)
    %c7_i32_52 = arith.constant 7 : i32
    %c7_i32_53 = arith.constant 7 : i32
    %c0_i32_54 = arith.constant 0 : i32
    %98 = tpu.memref_slice %arg3[%7, %c0_i32_54] : memref<100x32xf32, #tpu.memory_space<any>> -> memref<1x32xf32, #tpu.memory_space<any>>
    %99 = tpu.memref_squeeze %98 : memref<1x32xf32, #tpu.memory_space<any>> -> memref<32xf32, #tpu.memory_space<any>>
    %c0_i32_55 = arith.constant 0 : i32
    %100 = tpu.memref_slice %arg11[%c7_i32_52, %c0_i32_55] : memref<8x32xf32, #tpu.memory_space<vmem>> -> memref<1x32xf32, #tpu.memory_space<vmem>>
    %101 = tpu.memref_squeeze %100 : memref<1x32xf32, #tpu.memory_space<vmem>> -> memref<32xf32, #tpu.memory_space<vmem>>
    %102 = tpu.memref_slice %arg12[%c7_i32_53] : memref<8x!tpu.dma_semaphore, #tpu.memory_space<semaphore_mem>> -> memref<1x!tpu.dma_semaphore, #tpu.memory_space<semaphore_mem>>
    %103 = tpu.memref_squeeze %102 : memref<1x!tpu.dma_semaphore, #tpu.memory_space<semaphore_mem>> -> memref<!tpu.dma_semaphore, #tpu.memory_space<semaphore_mem>>
    tpu.wait_dma2 semaphore(%103 : memref<!tpu.dma_semaphore, #tpu.memory_space<semaphore_mem>>) src(%99 : memref<32xf32, #tpu.memory_space<any>>) dst(%101 : memref<32xf32, #tpu.memory_space<vmem>>)
    %c0_56 = arith.constant 0 : index
    %c0_57 = arith.constant 0 : index
    %104 = vector.load %arg11[%c0_56, %c0_57] : memref<8x32xf32, #tpu.memory_space<vmem>>, vector<8x32xf32>
    %105 = arith.truncf %104 : vector<8x32xf32> to vector<8x32xbf16>
    %c0_58 = arith.constant 0 : index
    %c0_59 = arith.constant 0 : index
    %106 = vector.load %arg1[%c0_58, %c0_59] : memref<8x128xf32, #tpu.memory_space<vmem>>, vector<8x128xf32>
    %c0_60 = arith.constant 0 : index
    %c0_61 = arith.constant 0 : index
    %107 = vector.load %arg4[%c0_60, %c0_61] : memref<32x384xbf16, #tpu.memory_space<vmem>>, vector<32x384xbf16>
    %cst = arith.constant dense<0.000000e+00> : vector<8x384xf32>
    %108 = tpu.matmul %105, %107, %cst {dimension_numbers = #tpu.dot_dimension_numbers<[1], [0], [0], [1], [0, 0, 1, 1], [], []>} : vector<8x32xbf16>, vector<32x384xbf16>, vector<8x384xf32> -> vector<8x384xf32>
    %c0_62 = arith.constant 0 : index
    %c0_63 = arith.constant 0 : index
    %109 = vector.load %arg6[%c0_62, %c0_63] : memref<4x384xf32, #tpu.memory_space<vmem>>, vector<1x384xf32>
    %110 = vector.broadcast %109 : vector<1x384xf32> to vector<8x384xf32>
    %111 = arith.addf %108, %110 : vector<8x384xf32>
    %112 = arith.truncf %106 : vector<8x128xf32> to vector<8x128xbf16>
    %c0_64 = arith.constant 0 : index
    %c0_65 = arith.constant 0 : index
    %113 = vector.load %arg5[%c0_64, %c0_65] : memref<128x384xbf16, #tpu.memory_space<vmem>>, vector<128x384xbf16>
    %cst_66 = arith.constant dense<0.000000e+00> : vector<8x384xf32>
    %114 = tpu.matmul %112, %113, %cst_66 {dimension_numbers = #tpu.dot_dimension_numbers<[1], [0], [0], [1], [0, 0, 1, 1], [], []>} : vector<8x128xbf16>, vector<128x384xbf16>, vector<8x384xf32> -> vector<8x384xf32>
    %c1_67 = arith.constant 1 : index
    %c0_68 = arith.constant 0 : index
    %115 = vector.load %arg6[%c1_67, %c0_68] : memref<4x384xf32, #tpu.memory_space<vmem>>, vector<1x384xf32>
    %116 = vector.broadcast %115 : vector<1x384xf32> to vector<8x384xf32>
    %117 = arith.addf %114, %116 : vector<8x384xf32>
    %118 = vector.extract_strided_slice %111 {offsets = [0, 0], sizes = [8, 128], strides = [1, 1]} : vector<8x384xf32> to vector<8x128xf32>
    %119 = vector.extract_strided_slice %117 {offsets = [0, 0], sizes = [8, 128], strides = [1, 1]} : vector<8x384xf32> to vector<8x128xf32>
    %120 = arith.addf %118, %119 : vector<8x128xf32>
    %121 = arith.negf %120 : vector<8x128xf32>
    %122 = math.exp %121 : vector<8x128xf32>
    %cst_69 = arith.constant 1.000000e+00 : f32
    %123 = vector.broadcast %cst_69 : f32 to vector<8x128xf32>
    %124 = arith.addf %123, %122 : vector<8x128xf32>
    %125 = arith.divf %123, %124 : vector<8x128xf32>
    %126 = vector.extract_strided_slice %111 {offsets = [0, 128], sizes = [8, 128], strides = [1, 1]} : vector<8x384xf32> to vector<8x128xf32>
    %127 = vector.extract_strided_slice %117 {offsets = [0, 128], sizes = [8, 128], strides = [1, 1]} : vector<8x384xf32> to vector<8x128xf32>
    %128 = arith.addf %126, %127 : vector<8x128xf32>
    %129 = arith.negf %128 : vector<8x128xf32>
    %130 = math.exp %129 : vector<8x128xf32>
    %cst_70 = arith.constant 1.000000e+00 : f32
    %131 = vector.broadcast %cst_70 : f32 to vector<8x128xf32>
    %132 = arith.addf %131, %130 : vector<8x128xf32>
    %133 = arith.divf %131, %132 : vector<8x128xf32>
    %134 = vector.extract_strided_slice %111 {offsets = [0, 256], sizes = [8, 128], strides = [1, 1]} : vector<8x384xf32> to vector<8x128xf32>
    %135 = vector.extract_strided_slice %117 {offsets = [0, 256], sizes = [8, 128], strides = [1, 1]} : vector<8x384xf32> to vector<8x128xf32>
    %136 = arith.mulf %125, %135 : vector<8x128xf32>
    %137 = arith.addf %134, %136 : vector<8x128xf32>
    %138 = math.tanh %137 : vector<8x128xf32>
    %cst_71 = arith.constant 1.000000e+00 : f32
    %139 = vector.broadcast %cst_71 : f32 to vector<8x128xf32>
    %140 = arith.subf %139, %133 : vector<8x128xf32>
    %141 = arith.mulf %140, %138 : vector<8x128xf32>
    %142 = arith.mulf %133, %106 : vector<8x128xf32>
    %143 = arith.addf %141, %142 : vector<8x128xf32>
    %c0_72 = arith.constant 0 : index
    %c0_73 = arith.constant 0 : index
    %c0_74 = arith.constant 0 : index
    %144 = vector.load %arg2[%c0_72, %c0_73, %c0_74] : memref<8x8x128xbf16, #tpu.memory_space<vmem>>, vector<8x8x128xbf16>
    %145 = arith.extf %144 : vector<8x8x128xbf16> to vector<8x8x128xf32>
    %146 = vector.shape_cast %143 : vector<8x128xf32> to vector<8x1x128xf32>
    %147 = vector.broadcast %146 : vector<8x1x128xf32> to vector<8x8x128xf32>
    %148 = arith.mulf %147, %145 : vector<8x8x128xf32>
    %cst_75 = arith.constant dense<0.000000e+00> : vector<8x8xf32>
    %149 = vector.multi_reduction <add>, %148, %cst_75 [2] : vector<8x8x128xf32> to vector<8x8xf32>
    %cst_76 = arith.constant dense<0xFF800000> : vector<8xf32>
    %150 = vector.multi_reduction <maximumf>, %149, %cst_76 [1] : vector<8x8xf32> to vector<8xf32>
    %151 = vector.shape_cast %150 : vector<8xf32> to vector<8x1xf32>
    %152 = vector.broadcast %151 : vector<8x1xf32> to vector<8x8xf32>
    %153 = arith.subf %149, %152 : vector<8x8xf32>
    %154 = math.exp %153 : vector<8x8xf32>
    %cst_77 = arith.constant dense<0.000000e+00> : vector<8xf32>
    %155 = vector.multi_reduction <add>, %154, %cst_77 [1] : vector<8x8xf32> to vector<8xf32>
    %156 = vector.shape_cast %155 : vector<8xf32> to vector<8x1xf32>
    %157 = vector.broadcast %156 : vector<8x1xf32> to vector<8x8xf32>
    %158 = arith.divf %154, %157 : vector<8x8xf32>
    %159 = vector.shape_cast %158 : vector<8x8xf32> to vector<8x8x1xf32>
    %160 = vector.broadcast %159 : vector<8x8x1xf32> to vector<8x8x128xf32>
    %161 = arith.mulf %160, %145 : vector<8x8x128xf32>
    %cst_78 = arith.constant dense<0.000000e+00> : vector<8x128xf32>
    %162 = vector.multi_reduction <add>, %161, %cst_78 [1] : vector<8x8x128xf32> to vector<8x128xf32>
    %163 = arith.truncf %143 : vector<8x128xf32> to vector<8x128xbf16>
    %c0_79 = arith.constant 0 : index
    %c0_80 = arith.constant 0 : index
    %164 = vector.load %arg7[%c0_79, %c0_80] : memref<128x128xbf16, #tpu.memory_space<vmem>>, vector<128x128xbf16>
    %cst_81 = arith.constant dense<0.000000e+00> : vector<8x128xf32>
    %165 = tpu.matmul %163, %164, %cst_81 {dimension_numbers = #tpu.dot_dimension_numbers<[1], [0], [0], [1], [0, 0, 1, 1], [], []>} : vector<8x128xbf16>, vector<128x128xbf16>, vector<8x128xf32> -> vector<8x128xf32>
    %166 = arith.truncf %162 : vector<8x128xf32> to vector<8x128xbf16>
    %c0_82 = arith.constant 0 : index
    %c0_83 = arith.constant 0 : index
    %167 = vector.load %arg8[%c0_82, %c0_83] : memref<128x128xbf16, #tpu.memory_space<vmem>>, vector<128x128xbf16>
    %cst_84 = arith.constant dense<0.000000e+00> : vector<8x128xf32>
    %168 = tpu.matmul %166, %167, %cst_84 {dimension_numbers = #tpu.dot_dimension_numbers<[1], [0], [0], [1], [0, 0, 1, 1], [], []>} : vector<8x128xbf16>, vector<128x128xbf16>, vector<8x128xf32> -> vector<8x128xf32>
    %169 = arith.addf %165, %168 : vector<8x128xf32>
    %c2_85 = arith.constant 2 : index
    %c0_86 = arith.constant 0 : index
    %170 = vector.load %arg6[%c2_85, %c0_86] : memref<4x384xf32, #tpu.memory_space<vmem>>, vector<1x128xf32>
    %171 = vector.broadcast %170 : vector<1x128xf32> to vector<8x128xf32>
    %172 = arith.addf %169, %171 : vector<8x128xf32>
    %173 = math.tanh %172 : vector<8x128xf32>
    %174 = arith.truncf %173 : vector<8x128xf32> to vector<8x128xbf16>
    %c0_87 = arith.constant 0 : index
    %c0_88 = arith.constant 0 : index
    %175 = vector.load %arg9[%c0_87, %c0_88] : memref<128x128xbf16, #tpu.memory_space<vmem>>, vector<128x128xbf16>
    %cst_89 = arith.constant dense<0.000000e+00> : vector<8x128xf32>
    %176 = tpu.matmul %174, %175, %cst_89 {dimension_numbers = #tpu.dot_dimension_numbers<[1], [0], [0], [1], [0, 0, 1, 1], [], []>} : vector<8x128xbf16>, vector<128x128xbf16>, vector<8x128xf32> -> vector<8x128xf32>
    %c3_90 = arith.constant 3 : index
    %c0_91 = arith.constant 0 : index
    %177 = vector.load %arg6[%c3_90, %c0_91] : memref<4x384xf32, #tpu.memory_space<vmem>>, vector<1x128xf32>
    %178 = vector.broadcast %177 : vector<1x128xf32> to vector<8x128xf32>
    %179 = arith.addf %176, %178 : vector<8x128xf32>
    %cst_92 = arith.constant dense<0xFF800000> : vector<8xf32>
    %180 = vector.multi_reduction <maximumf>, %179, %cst_92 [1] : vector<8x128xf32> to vector<8xf32>
    %181 = vector.shape_cast %180 : vector<8xf32> to vector<8x1xf32>
    %182 = vector.broadcast %181 : vector<8x1xf32> to vector<8x128xf32>
    %183 = arith.subf %179, %182 : vector<8x128xf32>
    %184 = math.exp %183 : vector<8x128xf32>
    %cst_93 = arith.constant dense<0.000000e+00> : vector<8xf32>
    %185 = vector.multi_reduction <add>, %184, %cst_93 [1] : vector<8x128xf32> to vector<8xf32>
    %186 = vector.shape_cast %185 : vector<8xf32> to vector<8x1xf32>
    %187 = math.log %186 : vector<8x1xf32>
    %188 = vector.broadcast %187 : vector<8x1xf32> to vector<8x128xf32>
    %189 = arith.subf %183, %188 : vector<8x128xf32>
    %c0_94 = arith.constant 0 : index
    %c0_95 = arith.constant 0 : index
    %190 = vector.load %arg10[%c0_94, %c0_95] : memref<8x384xf32, #tpu.memory_space<vmem>>, vector<8x128xf32>
    tpu.vector_store %arg10[%c0_94, %c0_95], %189 {strides = array<i32>} : memref<8x384xf32, #tpu.memory_space<vmem>>, vector<8x128xf32>,
    %c0_96 = arith.constant 0 : index
    %c128 = arith.constant 128 : index
    %191 = vector.load %arg10[%c0_96, %c128] : memref<8x384xf32, #tpu.memory_space<vmem>>, vector<8x128xf32>
    tpu.vector_store %arg10[%c0_96, %c128], %143 {strides = array<i32>} : memref<8x384xf32, #tpu.memory_space<vmem>>, vector<8x128xf32>,
    %c0_97 = arith.constant 0 : index
    %c256 = arith.constant 256 : index
    %192 = vector.load %arg10[%c0_97, %c256] : memref<8x384xf32, #tpu.memory_space<vmem>>, vector<8x8xf32>
    tpu.vector_store %arg10[%c0_97, %c256], %158 {strides = array<i32>} : memref<8x384xf32, #tpu.memory_space<vmem>>, vector<8x8xf32>,
    return
  }
}

</mosaic_0001>

<bundles_post_ra>
// kernel: step.1
= control target key start
LH: loop header
LB: loop body
LE: loop exit
PB: predicated region body
PF: predicated region fallthrough
CT: control target
= control target key end

     0   :  { %15 = vsyncpa [#allocation5], 0  ;;  %s2834_s0 = inlined_call_operand.vmem [shape: s32[8], index: 0, kind: input, shape index: {}]   ;;  %s2835_s1 = inlined_call_operand.vmem [shape: f32[8,128], index: 1, kind: input, shape index: {}]   ;;  %s2836_s2 = inlined_call_operand.vmem [shape: bf16[8,8,128], index: 2, kind: input, shape index: {}]   ;;  %s2837_s3 = inlined_call_operand.vmem [shape: f32[100,32], index: 3, kind: input, shape index: {}]   ;;  %s2838_s4 = inlined_call_operand.vmem [shape: bf16[32,384], index: 4, kind: input, shape index: {}]   ;;  %s2839_s5 = inlined_call_operand.vmem [shape: bf16[128,384], index: 5, kind: input, shape index: {}]   ;;  %s2840_s6 = inlined_call_operand.vmem [shape: f32[4,384], index: 6, kind: input, shape index: {}]   ;;  %s2841_s7 = inlined_call_operand.vmem [shape: bf16[128,128], index: 7, kind: input, shape index: {}]   ;;  %s2842_s8 = inlined_call_operand.vmem [shape: bf16[128,128], index: 8, kind: input, shape index: {}]   ;;  %s2843_s9 = inlined_call_operand.vmem [shape: bf16[128,128], index: 9, kind: input, shape index: {}]   ;;  %s2844_s10 = inlined_call_operand.vmem [shape: f32[8,384], index: 10, kind: output, shape index: {}]  }
   0x1   :  { %s22_s15 = sshll.u32 %s2834_s0, 4  ;;  %s23_s15 = int_to_ptr.vmem [resolvable:$true] %s22_s15 }
   0x2   :  { %s2269_s16 = scalar_lea.vmem %s23_s15, 16  ;;  %p2274_p1 = scmp.lt.s32.totalorder %s23_s15, %s23_s15 }
   0x3   :  { %p2270_p0 = scmp.ne.s32.totalorder %s23_s15, %s2269_s16  ;;  %p2275_p2 = scmp.lt.s32.totalorder %s2269_s16, %s2269_s16 }
   0x5   :  { %p2276_p3 = por %p2275_p2, %p2274_p1 }
   0x7   :  { %p2277_p4 = pnand %p2276_p3, %p2270_p0 }
   0x9   :  { %2280 = shalt.err (!%p2277_p4)
}
   0xa   :  { %s2299_s17 = smov [#allocation4]  }
   0xb   :  { %25 = dma.vmem_to_smem %s23_s15, 16, %s2299_s17, [#allocation5]  }
   0xc   :  { %2281 = dma.done.wait [#allocation5], 16  }
   0xd   :  { %2282 = vsyncadd [#allocation5], 4294967280 }
   0xe   :  { %45 = sfence }
   0xf   :  { %s47_s18 = sld [smem:[#allocation4]]  ;;  %s1922_s19 = sld [smem:[#allocation4 + $0x1]] }
  0x10   :  { %s1923_s20 = sld [smem:[#allocation4 + $0x2]]  ;;  %s1924_s21 = sld [smem:[#allocation4 + $0x3]] }
  0x11   :  { %s1925_s22 = sld [smem:[#allocation4 + $0x4]]  ;;  %s1926_s23 = sld [smem:[#allocation4 + $0x5]] }
  0x12   :  { %s1927_s0 = sld [smem:[#allocation4 + $0x6]]  ;;  %s2362_s24 = sld [smem:[#allocation4 + $0x7]] }
  0x15   :  { %s55_s27 = scalar_lea.vmem %s2837_s3, %s47_s18 }
  0x16   :  { %v73_v0 = vld [vmem:[%s55_s27] sm:$0x1] }
  0x17   :  { %74 = vst [vmem:[#allocation2] sm:$0x1] %v73_v0 }
  0x18   :  { %99 = vsyncadd [#allocation3], 16  ;;  %s100_s30 = scalar_lea.vmem %s2837_s3, %s1922_s19 }
  0x19   :  { %v120_v1 = vld [vmem:[%s100_s30] sm:$0x1] }
  0x1a   :  { %121 = vst [vmem:[#allocation2 + $0x1] sm:$0x1] %v120_v1 }
  0x1b   :  { %146 = vsyncadd [#allocation3 + $0x1], 16  ;;  %s147_s13 = scalar_lea.vmem %s2837_s3, %s1923_s20 }
  0x1c   :  { %v167_v2 = vld [vmem:[%s147_s13] sm:$0x1] }
  0x1d   :  { %168 = vst [vmem:[#allocation2 + $0x2] sm:$0x1] %v167_v2 }
  0x1e   :  { %193 = vsyncadd [#allocation3 + $0x2], 16  ;;  %s194_s16 = scalar_lea.vmem %s2837_s3, %s1924_s21 }
  0x1f   :  { %v214_v3 = vld [vmem:[%s194_s16] sm:$0x1] }
  0x20   :  { %215 = vst [vmem:[#allocation2 + $0x3] sm:$0x1] %v214_v3 }
  0x21   :  { %240 = vsyncadd [#allocation3 + $0x3], 16  ;;  %s241_s19 = scalar_lea.vmem %s2837_s3, %s1925_s22 }
  0x22   :  { %v261_v4 = vld [vmem:[%s241_s19] sm:$0x1] }
  0x23   :  { %262 = vst [vmem:[#allocation2 + $0x4] sm:$0x1] %v261_v4 }
  0x24   :  { %287 = vsyncadd [#allocation3 + $0x4], 16  ;;  %s288_s20 = scalar_lea.vmem %s2837_s3, %s1926_s23 }
  0x25   :  { %v308_v5 = vld [vmem:[%s288_s20] sm:$0x1] }
  0x26   :  { %309 = vst [vmem:[#allocation2 + $0x5] sm:$0x1] %v308_v5 }
  0x27   :  { %334 = vsyncadd [#allocation3 + $0x5], 16  ;;  %s335_s21 = scalar_lea.vmem %s2837_s3, %s1927_s0 }
  0x28   :  { %v355_v6 = vld [vmem:[%s335_s21] sm:$0x1] }
  0x29   :  { %356 = vst [vmem:[#allocation2 + $0x6] sm:$0x1] %v355_v6 }
  0x2a   :  { %381 = vsyncadd [#allocation3 + $0x6], 16  ;;  %s382_s30 = scalar_lea.vmem %s2837_s3, %s2362_s24 }
  0x2b   :  { %v402_v7 = vld [vmem:[%s382_s30] sm:$0x1] }
  0x2c   :  { %403 = vst [vmem:[#allocation2 + $0x7] sm:$0x1] %v402_v7 }
  0x2d   :  { %428 = vsyncadd [#allocation3 + $0x7], 16 }
  0x2e   :  { %2283 = dma.done.wait [#allocation3], 16 }
  0x2f   :  { %2284 = vsyncadd [#allocation3], 4294967280 }
  0x30   :  { %2285 = dma.done.wait [#allocation3 + $0x1], 16 }
  0x31   :  { %2286 = vsyncadd [#allocation3 + $0x1], 4294967280 }
  0x32   :  { %2287 = dma.done.wait [#allocation3 + $0x2], 16 }
  0x33   :  { %2288 = vsyncadd [#allocation3 + $0x2], 4294967280 }
  0x34   :  { %2289 = dma.done.wait [#allocation3 + $0x3], 16 }
  0x35   :  { %2290 = vsyncadd [#allocation3 + $0x3], 4294967280 }
  0x36   :  { %2291 = dma.done.wait [#allocation3 + $0x4], 16 }
  0x37   :  { %2292 = vsyncadd [#allocation3 + $0x4], 4294967280 }
  0x38   :  { %2293 = dma.done.wait [#allocation3 + $0x5], 16 }
  0x39   :  { %2294 = vsyncadd [#allocation3 + $0x5], 4294967280 }
  0x3a   :  { %2295 = dma.done.wait [#allocation3 + $0x6], 16 }
  0x3b   :  { %2296 = vsyncadd [#allocation3 + $0x6], 4294967280 }
  0x3c   :  { %2297 = dma.done.wait [#allocation3 + $0x7], 16 }
  0x3d   :  { %2298 = vsyncadd [#allocation3 + $0x7], 4294967280  ;;  %v2300_v8 = vmov 0   ;;  %v2157_v9 = vld [vmem:[%s2839_s5 + $0x4] ss:$12 sps:$4 sm:$0xff]   ;;  %vm505_vm0 = vcmask 261120   ;;  %v458_v52 = vlaneseq }
  0x3e   :  { %541 = vmatprep.mubr.bf16.mxu1 %v2300_v8  ;;  %801 = vmatprep.mubr.bf16.mxu0 %v2300_v8  ;;  %v2159_v10 = vld [vmem:[%s2839_s5] ss:$12 sps:$4 sm:$0xff]   ;;  %v2160_v11 = vld [vmem:[%s2839_s5 + $0x1c] ss:$12 sps:$4 sm:$0xff]   ;;  %v2162_v12 = vld [vmem:[%s2839_s5 + $0x18] ss:$12 sps:$4 sm:$0xff]  }
  0x3f   :  { %2156 = vset.pattern.permute.xlu0 %v2300_v8  ;;  %2155 = vset.pattern.permute.xlu1 %v2300_v8  ;;  %v2163_v13 = vld [vmem:[%s2838_s4 + $0x4] ss:$12 sps:$4 sm:$0xff]   ;;  %v2165_v14 = vld [vmem:[%s2838_s4] ss:$12 sps:$4 sm:$0xff]   ;;  %v2169_v16 = vld [vmem:[%s2838_s4 + $0x1c] ss:$12 sps:$4 sm:$0xff]  }
  0x40   :  { %769 = vmatprep.subr.bf16.mxu0 %v2157_v9  ;;  %v2166_v15 = vld [vmem:[%s2839_s5 + $0x34] ss:$12 sps:$4 sm:$0xff]   ;;  %509 = vmatprep.subr.bf16.mxu1 %v2163_v13  ;;  %v2171_v17 = vld [vmem:[%s2838_s4 + $0x18] ss:$12 sps:$4 sm:$0xff]   ;;  %v2168_v18 = vld [vmem:[%s2839_s5 + $0x30] ss:$12 sps:$4 sm:$0xff]  }
  0x41   :  { %770 = vmatpush1.bf16.msra.mxu0 %v2159_v10  ;;  %510 = vmatpush1.bf16.msra.mxu1 %v2165_v14  ;;  %v2172_v19 = vld [vmem:[%s2839_s5 + $0x4c] ss:$12 sps:$4 sm:$0xff]   ;;  %v445_v20 = vld [vmem:[#allocation2] sm:$0xff]  ;;  %v2175_v22 = vld [vmem:[%s2838_s4 + $0x8] ss:$12 sps:$4 sm:$0xff]   ;;  %v2301_v24 = vmov 0.0  }
  0x42   :  { %771 = vmatprep.subr.bf16.mxu0 %v2160_v11  ;;  %511 = vmatprep.subr.bf16.mxu1 %v2169_v16  ;;  %v446_v21 = vpack.c.bf16 %v445_v20, %v445_v20  ;;  %v2174_v23 = vld [vmem:[%s2839_s5 + $0x48] ss:$12 sps:$4 sm:$0xff]   ;;  %v2176_v25 = vld [vmem:[%s2839_s5 + $0x64] ss:$12 sps:$4 sm:$0xff]   ;;  %v2179_v26 = vld [vmem:[%s2838_s4 + $0x20] ss:$12 sps:$4 sm:$0xff]  }
  0x43   :  { %vm2302_vm1 = vmmov 0   ;;  %v2178_v27 = vld [vmem:[%s2839_s5 + $0x60] ss:$12 sps:$4 sm:$0xff]   ;;  %v2180_v28 = vld [vmem:[%s2839_s5 + $0x7c] ss:$12 sps:$4 sm:$0xff]   ;;  %v2199_v46 = vld [vmem:[%s2841_s7 + $0x10] sm:$0xff]  }
  0x44   :  { %v2185_v29 = vld [vmem:[%s2839_s5 + $0x8] ss:$12 sps:$4 sm:$0xff]   ;;  %v2182_v30 = vld [vmem:[%s2839_s5 + $0x78] ss:$12 sps:$4 sm:$0xff]   ;;  %v2189_v32 = vld [vmem:[%s2839_s5 + $0x20] ss:$12 sps:$4 sm:$0xff]  }
  0x45   :  { %772 = vmatpush1.bf16.msra.mxu0 %v2162_v12  ;;  %512 = vmatpush1.bf16.msra.mxu1 %v2171_v17  ;;  %v2183_v31 = vld [vmem:[%s2839_s5 + $0x94] ss:$12 sps:$4 sm:$0xff]   ;;  %v2186_v33 = vld [vmem:[%s2839_s5 + $0x90] ss:$12 sps:$4 sm:$0xff]   ;;  %v2187_v34 = vld [vmem:[%s2839_s5 + $0xac] ss:$12 sps:$4 sm:$0xff]  }
  0x46   :  { %773 = vmatprep.subr.bf16.mxu0 %v2166_v15  ;;  %2056 = vmatprep.subr.bf16.mxu1 %v2301_v24  ;;  %v2191_v35 = vld [vmem:[%s2839_s5 + $0x38] ss:$12 sps:$4 sm:$0xff]   ;;  %v2190_v36 = vld [vmem:[%s2839_s5 + $0xa8] ss:$12 sps:$4 sm:$0xff]   ;;  %v2192_v38 = vld [vmem:[%s2839_s5 + $0x50] ss:$12 sps:$4 sm:$0xff]  }
  0x47   :  { %v2477_v37 = vld [vmem:[%s2835_s1] sm:$0xff]  ;;  %v2193_v40 = vld [vmem:[%s2839_s5 + $0x68] ss:$12 sps:$4 sm:$0xff]   ;;  %v2196_v43 = vld [vmem:[%s2839_s5 + $0xb0] ss:$12 sps:$4 sm:$0xff]   ;;  %v2540_v57 = vshrl.u32 %v458_v52, 7 }
  0x48   :  { %1935 = vmatmul.mubr.msk.bf16.vlgmr.msra.gmra.mrb[0].mxu1 %vm505_vm0, %v446_v21  ;;  %v590_v39 = vpack.c.bf16 %v2477_v37, %v2477_v37  ;;  %v2194_v41 = vld [vmem:[%s2839_s5 + $0x80] ss:$12 sps:$4 sm:$0xff]   ;;  %v2195_v42 = vld [vmem:[%s2839_s5 + $0x98] ss:$12 sps:$4 sm:$0xff]   ;;  %v2203_v50 = vld [vmem:[%s2841_s7 + $0x30] sm:$0xff]   ;;  %vm1043_vm2 = vcmask 1041409  }
  0x49   :  { %774 = vmatpush1.bf16.msra.mxu0 %v2168_v18  ;;  %2057 = vmatpush3.bf16.msra.mxu1 %v2175_v22  ;;  %v2197_v44 = vld [vmem:[%s2841_s7] sm:$0xff]   ;;  %v2198_v45 = vld [vmem:[%s2841_s7 + $0x8] sm:$0xff]   ;;  %v2200_v47 = vld [vmem:[%s2841_s7 + $0x18] sm:$0xff]   ;;  %v2543_v58 = vsub.s32 0, %v2540_v57  ;;  %v2549_v61 = vsub.s32 1, %v2540_v57  ;;  %v2559_v20 = vsub.s32 2, %v2540_v57 }
  0x4a   :  { %775 = vmatprep.subr.bf16.mxu0 %v2172_v19  ;;  %2060 = vmatprep.mubr.msk.bf16.mxu1 %vm2302_vm1, %v2301_v24  ;;  %v2201_v48 = vld [vmem:[%s2841_s7 + $0x20] sm:$0xff]   ;;  %v2202_v49 = vld [vmem:[%s2841_s7 + $0x28] sm:$0xff]   ;;  %v2204_v51 = vld [vmem:[%s2841_s7 + $0x38] sm:$0xff]   ;;  %vm1045_vm3 = vcmask 1042434   ;;  %vm1047_vm4 = vcmask 1043459   ;;  %vm1049_vm5 = vcmask 1044484  }
  0x4b   :  { %2058 = vmatprep.subr.bf16.mxu1 %v2301_v24  ;;  %v456_v60 = vld [vmem:[%s2840_s6] ss:$4 sm:$0x7]  ;;  %v1937_v3 = vld [vmem:[%s2840_s6 + $0x1] ss:$4 sm:$0x7] }
  0x4c   :  { %v461_v1 = vrot.slane %v456_v60, %v2543_v58  ;;  %v465_v2 = vrot.slane %v456_v60, %v2549_v61  ;;  %v629_v5 = vrot.slane %v1937_v3, %v2543_v58  ;;  %v633_v7 = vrot.slane %v1937_v3, %v2549_v61 }
  0x4d   :  { %776 = vmatpush1.bf16.msra.mxu0 %v2174_v23  ;;  %2059 = vmatpush3.bf16.msra.mxu1 %v2179_v26  ;;  %v637_v23 = vrot.slane %v1937_v3, %v2559_v20  ;;  %vm1051_vm6 = vcmask 1045509   ;;  %vm1053_vm7 = vcmask 1046534   ;;  %vm1055_vm8 = vcmask 1047559  }
  0x4e   :  { %777 = vmatprep.subr.bf16.mxu0 %v2176_v25  ;;  %2064 = vmatprep.subr.bf16.mxu1 %v2301_v24  ;;  %vm1058_vm9 = vcmask 64512  }
  0x50   :  { %2061 = vmatmul.mubr.msk.bf16.vlgmr.msra.gmra.mrb[4].mxu1 %vm505_vm0, %v446_v21 }
  0x51   :  { %778 = vmatpush1.bf16.msra.mxu0 %v2178_v27  ;;  %2065 = vmatpush3.bf16.msra.mxu1 %v2185_v29 }
  0x52   :  { %779 = vmatprep.subr.bf16.mxu0 %v2180_v28  ;;  %2080 = vmatprep.mubr.msk.bf16.mxu1 %vm2302_vm1, %v2301_v24  ;;  %v469_v28 = vrot.slane %v456_v60, %v2559_v20 }
  0x53   :  { %2066 = vmatprep.subr.bf16.mxu1 %v2301_v24 }
  0x55   :  { %780 = vmatpush1.bf16.msra.mxu0 %v2182_v30  ;;  %2067 = vmatpush3.bf16.msra.mxu1 %v2189_v32 }
  0x56   :  { %781 = vmatprep.subr.bf16.mxu0 %v2183_v31  ;;  %2068 = vmatprep.subr.bf16.mxu1 %v2301_v24 }
  0x59   :  { %782 = vmatpush1.bf16.msra.mxu0 %v2186_v33  ;;  %2069 = vmatpush3.bf16.msra.mxu1 %v2191_v35  ;;  %v2303_v35 = vmov 1966171168  }
  0x5a   :  { %783 = vmatprep.subr.bf16.mxu0 %v2187_v34  ;;  %2070 = vmatprep.subr.bf16.mxu1 %v2301_v24 }
  0x5d   :  { %784 = vmatpush1.bf16.msra.mxu0 %v2190_v36  ;;  %2071 = vmatpush3.bf16.msra.mxu1 %v2192_v38  ;;  %v890_v36 = vunpack.c.l.s4 %v2303_v35 }
  0x5e   :  { %2084 = vmatprep.subr.bf16.mxu0 %v2301_v24  ;;  %2072 = vmatprep.subr.bf16.mxu1 %v2301_v24 }
  0x60   :  { %802 = vmatmul.mubr.bf16.vlgmr.msra.gmra.mrb[0].mxu0 %v590_v39 }
  0x61   :  { %2100 = vmatprep.mubr.msk.bf16.mxu0 %vm2302_vm1, %v2301_v24  ;;  %2073 = vmatpush3.bf16.msra.mxu1 %v2193_v40 }
  0x62   :  { %2074 = vmatprep.subr.bf16.mxu1 %v2301_v24 }
  0x65   :  { %2075 = vmatpush3.bf16.msra.mxu1 %v2194_v41 }
  0x66   :  { %2076 = vmatprep.subr.bf16.mxu1 %v2301_v24 }
  0x69   :  { %2077 = vmatpush3.bf16.msra.mxu1 %v2195_v42 }
  0x6a   :  { %2078 = vmatprep.subr.bf16.mxu1 %v2301_v24 }
  0x6d   :  { %2079 = vmatpush3.bf16.msra.mxu1 %v2196_v43 }
  0x6e   :  { %2104 = vmatprep.subr.bf16.mxu1 %v2301_v24 }
  0x70   :  { %2081 = vmatmul.mubr.bf16.vlgmr.msra.gmra.mrb[8].mxu1 %v590_v39  ;;  %v891_v39 = vunpack.c.0.s8 %v890_v36 }
  0x71   :  { %2120 = vmatprep.mubr.msk.bf16.mxu1 %vm2302_vm1, %v2301_v24  ;;  %2105 = vmatpush3.bf16.msra.mxu1 %v2197_v44 }
  0x72   :  { %2106 = vmatprep.subr.bf16.mxu1 %v2301_v24  ;;  %v894_v44 = vsub.s32 %v891_v39, %v2540_v57 }
  0x75   :  { %2107 = vmatpush3.bf16.msra.mxu1 %v2198_v45 }
  0x76   :  { %2108 = vmatprep.subr.bf16.mxu1 %v2301_v24 }
  0x79   :  { %2109 = vmatpush3.bf16.msra.mxu1 %v2199_v46  ;;  %v2568_v46 = vld [vmem:[%s2836_s2] sm:$0xff]  }
  0x7a   :  { %2110 = vmatprep.subr.bf16.mxu1 %v2301_v24 }
  0x7d   :  { %2111 = vmatpush3.bf16.msra.mxu1 %v2200_v47 }
  0x7e   :  { %2112 = vmatprep.subr.bf16.mxu1 %v2301_v24 }
  0x81   :  { %2113 = vmatpush3.bf16.msra.mxu1 %v2201_v48 }
  0x82   :  { %2114 = vmatprep.subr.bf16.mxu1 %v2301_v24 }
  0x85   :  { %2115 = vmatpush3.bf16.msra.mxu1 %v2202_v49 }
  0x86   :  { %2116 = vmatprep.subr.bf16.mxu1 %v2301_v24 }
  0x89   :  { %2117 = vmatpush3.bf16.msra.mxu1 %v2203_v50  ;;  %v2000_v50 = vunpack.c.l.bf16 %v2568_v46 }
  0x8a   :  { %2118 = vmatprep.subr.bf16.mxu1 %v2301_v24 }
  0x8d   :  { %2119 = vmatpush3.bf16.msra.mxu1 %v2204_v51 }
 0x11b   :  { %v543_v53 = vpop.f32.mrb[0].mxu1 }
 0x11c   :  { %v545_v54 = vpop.f32.mrb[1].mxu1  ;;  %v544_v4 = vadd.f32 %v543_v53, %v461_v1 }
 0x11d   :  { %v547_v55 = vpop.f32.mrb[2].mxu1  ;;  %v546_v6 = vadd.f32 %v545_v54, %v465_v2 }
 0x11e   :  { %v548_v56 = vpop.f32.mrb[3].mxu1  ;;  %v2145_v8 = vadd.f32 %v629_v5, %v544_v4  ;;  %v2589_v5 = vld [vmem:[%s2836_s2 + $0x10] sm:$0xff]  }
 0x11f   :  { %v2148_v10 = vadd.f32 %v633_v7, %v546_v6 }
 0x123   :  { %v584_v59 = vpop.f32.mrb[4].mxu1 }
 0x124   :  { %v2062_v62 = vpop.f32.mrb[5].mxu1  ;;  %v585_v32 = vadd.f32 %v584_v59, %v469_v28 }
 0x125   :  { %v587_v63 = vpop.f32.mrb[6].mxu1  ;;  %v2001_v62 = vunpack.c.h.bf16 %v2568_v46 }
 0x126   :  { %v2063_v0 = vpop.f32.mrb[7].mxu1 }
 0x133   :  { %v803_v9 = vpop.f32.mrb[0].mxu0 }
 0x134   :  { %v2146_v11 = vadd.f32 %v2145_v8, %v803_v9  ;;  %v805_v12 = vpop.f32.mrb[1].mxu0 }
 0x135   :  { %v2149_v13 = vadd.f32 %v2148_v10, %v805_v12  ;;  %v807_v14 = vpop.f32.mrb[2].mxu0 }
 0x136   :  { %v1962_v15 = vmul.f32 -1.442695, %v2146_v11  ;;  %v808_v16 = vpop.f32.mrb[3].mxu0  ;;  %v2008_v11 = vunpack.c.l.bf16 %v2589_v5  ;;  %v2602_v14 = vld [vmem:[%s2836_s2 + $0x18] sm:$0xff]  }
 0x137   :  { %v1963_v17 = vmul.f32 -1.442695, %v2149_v13  ;;  %v2009_v16 = vunpack.c.h.bf16 %v2589_v5 }
 0x138   :  { %2221 = vpow2.f32 %v1962_v15 }
 0x139   :  { %2223 = vpow2.f32 %v1963_v17 }
 0x142   :  { %v2222_v18 = vpop.eup %2221 }
 0x143   :  { %v854_v19 = vadd.f32 1.0, %v2222_v18  ;;  %v844_v21 = vpop.f32.mrb[8].mxu1  ;;  %v2224_v26 = vpop.eup %2223 }
 0x144   :  { %v2082_v22 = vpop.f32.mrb[9].mxu1  ;;  %v861_v29 = vadd.f32 1.0, %v2224_v26  ;;  %v845_v30 = vadd.f32 %v844_v21, %v637_v23  ;;  %v2012_v21 = vunpack.c.l.bf16 %v2602_v14 }
 0x145   :  { %2225 = vrcp.f32 %v854_v19  ;;  %v847_v25 = vpop.f32.mrb[10].mxu1 }
 0x146   :  { %v2083_v27 = vpop.f32.mrb[11].mxu1  ;;  %2227 = vrcp.f32 %v861_v29  ;;  %v2013_v25 = vunpack.c.h.bf16 %v2602_v14  ;;  %v1010_v29 = vand.u32 127, %v458_v52 }
 0x14f   :  { %v2226_v31 = vpop.eup %2225 }
 0x150   :  { %v864_v33 = vmul.f32 %v2226_v31, %v845_v30  ;;  %v2228_v38 = vpop.eup %2227  ;;  %v2622_v31 = vsub.s32 %v1010_v29, %v2540_v57 }
 0x151   :  { %v867_v40 = vsub.f32 1.0, %v2228_v38  ;;  %v869_v42 = vmul.f32 %v2228_v38, %v2477_v37  ;;  %v2576_v37 = vld [vmem:[%s2836_s2 + $0x8] sm:$0xff]  }
 0x152   :  { %v865_v34 = vadd.f32 %v864_v33, %v585_v32  ;;  %v2004_v56 = vunpack.c.l.bf16 %v2576_v37  ;;  %v2005_v7 = vunpack.c.h.bf16 %v2576_v37 }
 0x154   :  { %2229 = vtanh.f32 %v865_v34 }
 0x15e   :  { %v2230_v41 = vpop.eup %2229 }
 0x15f   :  { %v868_v43 = vmul.f32 %v2230_v41, %v867_v40 }
 0x161   :  { %v870_v45 = vadd.f32 %v869_v42, %v868_v43 }
 0x163   :  { %v1355_v47 = vpack.c.bf16 %v870_v45, %v870_v45  ;;  %1725 = vst [vmem:[%s2844_s10 + $0x8] sm:$0xff] %v870_v45  ;;  %v895_v48 = vrot.slane %v870_v45, %v894_v44  ;;  %v888_v49 = vcombine.high %v870_v45, %v870_v45 }
 0x165   :  { %2121 = vmatmul.mubr.bf16.vlgmr.msra.gmra.mrb[12].mxu1 %v1355_v47  ;;  %v911_v51 = vrot.slane %v895_v48, %v894_v44  ;;  %v903_v53 = vcombine.high %v895_v48, %v895_v48  ;;  %v902_v54 = vrot.slane %v888_v49, %v894_v44 }
 0x167   :  { %v940_v55 = vrot.slane %v911_v51, %v2543_v58  ;;  %v933_v59 = vcombine.high %v911_v51, %v911_v51  ;;  %v925_v60 = vrot.slane %v903_v53, %v894_v44  ;;  %v918_v63 = vrot.slane %v902_v54, %v894_v44 }
 0x168   :  { %v904_v0 = vcombine.high %v902_v54, %v902_v54 }
 0x169   :  { %v977_v1 = vmul.f32 %v2000_v50, %v940_v55  ;;  %v948_v2 = vrot.slane %v933_v59, %v2543_v58  ;;  %v944_v3 = vrot.slane %v925_v60, %v2543_v58  ;;  %v935_v4 = vcombine.high %v925_v60, %v925_v60 }
 0x16a   :  { %v932_v9 = vrot.slane %v904_v0, %v894_v44  ;;  %v956_v12 = vrot.slane %v918_v63, %v2543_v58  ;;  %v934_v13 = vcombine.high %v918_v63, %v918_v63 }
 0x16b   :  { %985 = vadd.xlane.f32.xlu0 %v977_v1  ;;  %v979_v6 = vmul.f32 %v2004_v56, %v948_v2  ;;  %v952_v8 = vrot.slane %v935_v4, %v2543_v58  ;;  %v978_v10 = vmul.f32 %v2001_v62, %v944_v3  ;;  %v1077_v3 = vsub.s32 3, %v2540_v57 }
 0x16c   :  { %v960_v17 = vrot.slane %v932_v9, %v2543_v58  ;;  %v936_v18 = vcombine.high %v932_v9, %v932_v9  ;;  %v981_v19 = vmul.f32 %v2008_v11, %v956_v12  ;;  %v964_v22 = vrot.slane %v934_v13, %v2543_v58 }
 0x16d   :  { %989 = vadd.xlane.f32.xlu1 %v979_v6  ;;  %v980_v15 = vmul.f32 %v2005_v7, %v952_v8 }
 0x16e   :  { %v982_v23 = vmul.f32 %v2009_v16, %v960_v17  ;;  %v968_v26 = vrot.slane %v936_v18, %v2543_v58  ;;  %v983_v27 = vmul.f32 %v2012_v21, %v964_v22  ;;  %v1085_v22 = vsub.s32 5, %v2540_v57 }
 0x16f   :  { %987 = vadd.xlane.f32.xlu0 %v978_v10  ;;  %v1081_v10 = vsub.s32 4, %v2540_v57 }
 0x170   :  { %v984_v28 = vmul.f32 %v2013_v25, %v968_v26 }
 0x171   :  { %991 = vadd.xlane.f32.xlu1 %v980_v15 }
 0x173   :  { %993 = vadd.xlane.f32.xlu0 %v981_v19 }
 0x175   :  { %995 = vadd.xlane.f32.xlu1 %v982_v23 }
 0x177   :  { %997 = vadd.xlane.f32.xlu0 %v983_v27 }
 0x179   :  { %999 = vadd.xlane.f32.xlu1 %v984_v28  ;;  %v1089_v28 = vsub.s32 6, %v2540_v57 }
 0x1f8   :  { %v986_v30 = vpop.xlane.xlu0 %985 }
 0x1f9   :  { %v1014_v34 = vrot.slane %v986_v30, %v2622_v31 }
 0x1fa   :  { %v990_v32 = vpop.xlane.xlu1 %989 }
 0x1fb   :  { %v1022_v36 = vrot.slane %v990_v32, %v2622_v31 }
 0x1fc   :  { %v988_v33 = vpop.xlane.xlu0 %987 }
 0x1fd   :  { %v1018_v35 = vrot.slane %v988_v33, %v2622_v31 }
 0x1fe   :  { %v992_v38 = vpop.xlane.xlu1 %991 }
 0x1ff   :  { %v1044_v39 = vsel %vm1043_vm2, %v1018_v35, %v1014_v34  ;;  %v1026_v52 = vrot.slane %v992_v38, %v2622_v31 }
 0x200   :  { %v1046_v40 = vsel %vm1045_vm3, %v1022_v36, %v1044_v39  ;;  %v994_v41 = vpop.xlane.xlu0 %993 }
 0x201   :  { %v1048_v42 = vsel %vm1047_vm4, %v1026_v52, %v1046_v40  ;;  %v1030_v43 = vrot.slane %v994_v41, %v2622_v31 }
 0x202   :  { %v996_v44 = vpop.xlane.xlu1 %995 }
 0x203   :  { %v1050_v45 = vsel %vm1049_vm5, %v1030_v43, %v1048_v42  ;;  %v1034_v47 = vrot.slane %v996_v44, %v2622_v31 }
 0x204   :  { %v998_v48 = vpop.xlane.xlu0 %997 }
 0x205   :  { %v1038_v49 = vrot.slane %v998_v48, %v2622_v31  ;;  %v1052_v51 = vsel %vm1051_vm6, %v1034_v47, %v1050_v45 }
 0x206   :  { %v1000_v53 = vpop.xlane.xlu1 %999 }
 0x207   :  { %v1042_v54 = vrot.slane %v1000_v53, %v2622_v31  ;;  %v1054_v55 = vsel %vm1053_vm7, %v1038_v49, %v1052_v51 }
 0x209   :  { %v1056_v59 = vsel %vm1055_vm8, %v1042_v54, %v1054_v55 }
 0x20a   :  { %v1059_v60 = vsel %vm1058_vm9, %v1056_v59, -inf }
 0x20b   :  { %1060 = vmax.xlane.f32.xlu0 %v1059_v60 }
 0x238   :  { %v2640_v63 = vpop.f32.mrb[12].mxu1 }
 0x239   :  { %v2122_v0 = vpop.f32.mrb[13].mxu1 }
 0x23a   :  { %v1594_v1 = vpop.f32.mrb[14].mxu1 }
 0x23b   :  { %v2123_v2 = vpop.f32.mrb[15].mxu1 }
 0x298   :  { %v1061_v4 = vpop.xlane.xlu0 %1060 }
 0x299   :  { %v1066_v6 = vrot.slane %v1061_v4, %v2543_v58  ;;  %v1070_v8 = vrot.slane %v1061_v4, %v2549_v61  ;;  %v1074_v9 = vrot.slane %v1061_v4, %v2559_v20  ;;  %v1078_v12 = vrot.slane %v1061_v4, %v1077_v3 }
 0x29a   :  { %v1082_v23 = vrot.slane %v1061_v4, %v1081_v10  ;;  %v1086_v29 = vrot.slane %v1061_v4, %v1085_v22 }
 0x29b   :  { %v1103_v13 = vsub.f32 %v986_v30, %v1066_v6  ;;  %v1104_v15 = vsub.f32 %v988_v33, %v1070_v8  ;;  %v1105_v17 = vsub.f32 %v990_v32, %v1074_v9  ;;  %v1106_v26 = vsub.f32 %v992_v38, %v1078_v12 }
 0x29c   :  { %v1107_v34 = vsub.f32 %v994_v41, %v1082_v23  ;;  %v1093_v32 = vsub.s32 7, %v2540_v57  ;;  %v1090_v33 = vrot.slane %v1061_v4, %v1089_v28  ;;  %v1108_v35 = vsub.f32 %v996_v44, %v1086_v29  ;;  %v2205_v57 = vld [vmem:[%s2842_s8] sm:$0xff]  }
 0x29d   :  { %v1111_v18 = vmul.f32 1.442695, %v1103_v13  ;;  %v1113_v19 = vmul.f32 1.442695, %v1104_v15  ;;  %v1115_v27 = vmul.f32 1.442695, %v1105_v17  ;;  %2085 = vmatpush3.bf16.msra.mxu0 %v2205_v57 }
 0x29e   :  { %v1117_v30 = vmul.f32 1.442695, %v1106_v26  ;;  %v1119_v36 = vmul.f32 1.442695, %v1107_v34  ;;  %v1094_v52 = vrot.slane %v1061_v4, %v1093_v32  ;;  %v1109_v40 = vsub.f32 %v998_v48, %v1090_v33  ;;  %2086 = vmatprep.subr.bf16.mxu0 %v2301_v24 }
 0x29f   :  { %2231 = vpow2.f32 %v1111_v18  ;;  %v1121_v41 = vmul.f32 1.442695, %v1108_v35 }
 0x2a0   :  { %2233 = vpow2.f32 %v1113_v19  ;;  %v1110_v43 = vsub.f32 %v1000_v53, %v1094_v52  ;;  %v1123_v44 = vmul.f32 1.442695, %v1109_v40 }
 0x2a1   :  { %2235 = vpow2.f32 %v1115_v27 }
 0x2a2   :  { %2237 = vpow2.f32 %v1117_v30  ;;  %v1125_v47 = vmul.f32 1.442695, %v1110_v43 }
 0x2a3   :  { %2239 = vpow2.f32 %v1119_v36 }
 0x2a4   :  { %2241 = vpow2.f32 %v1121_v41 }
 0x2a5   :  { %2243 = vpow2.f32 %v1123_v44 }
 0x2a6   :  { %2245 = vpow2.f32 %v1125_v47 }
 0x2a9   :  { %v2232_v38 = vpop.eup %2231 }
 0x2aa   :  { %v2658_v39 = vpop.eup %2233  ;;  %1136 = vperm.xlu1 %2155, %v2232_v38  }
 0x2ab   :  { %1139 = vperm.xlu0 %2156, %v2658_v39   ;;  %v2663_v42 = vpop.eup %2235 }
 0x2ac   :  { %v2666_v45 = vpop.eup %2237 }
 0x2ad   :  { %v2669_v49 = vpop.eup %2239 }
 0x2ae   :  { %1142 = vperm.xlu1 %2155, %v2663_v42   ;;  %v2672_v48 = vpop.eup %2241 }
 0x2af   :  { %v2675_v51 = vpop.eup %2243 }
 0x2b0   :  { %v2678_v53 = vpop.eup %2245 }
 0x2b2   :  { %1145 = vperm.xlu1 %2155, %v2666_v45  }
 0x2b6   :  { %1148 = vperm.xlu1 %2155, %v2669_v49  }
 0x2ba   :  { %1151 = vperm.xlu1 %2155, %v2672_v48  }
 0x2be   :  { %1154 = vperm.xlu1 %2155, %v2675_v51  }
 0x2c2   :  { %1157 = vperm.xlu1 %2155, %v2678_v53  }
 0x329   :  { %v1137_v54 = vpop.permute.xlu1 %1136 }
 0x32a   :  { %v1140_v0 = vpop.permute.xlu0 %1139  ;;  %v1162_v4 = vrot.slane %v1137_v54, %v2622_v31 }
 0x32b   :  { %v1166_v2 = vrot.slane %v1140_v0, %v2622_v31 }
 0x32d   :  { %v1143_v55 = vpop.permute.xlu1 %1142  ;;  %v1191_v13 = vsel %vm1043_vm2, %v1166_v2, %v1162_v4  ;;  %v2211_v2 = vld [vmem:[%s2842_s8 + $0x30] sm:$0xff]   ;;  %v2212_v4 = vld [vmem:[%s2842_s8 + $0x38] sm:$0xff]  }
 0x32e   :  { %v1170_v6 = vrot.slane %v1143_v55, %v2622_v31 }
 0x330   :  { %v1192_v17 = vsel %vm1045_vm3, %v1170_v6, %v1191_v13 }
 0x331   :  { %v1146_v59 = vpop.permute.xlu1 %1145 }
 0x332   :  { %v1174_v8 = vrot.slane %v1146_v59, %v2622_v31 }
 0x334   :  { %v1193_v19 = vsel %vm1047_vm4, %v1174_v8, %v1192_v17 }
 0x335   :  { %v1149_v60 = vpop.permute.xlu1 %1148 }
 0x336   :  { %v1178_v9 = vrot.slane %v1149_v60, %v2622_v31 }
 0x338   :  { %v1194_v23 = vsel %vm1049_vm5, %v1178_v9, %v1193_v19 }
 0x339   :  { %v1152_v1 = vpop.permute.xlu1 %1151 }
 0x33a   :  { %v1182_v15 = vrot.slane %v1152_v1, %v2622_v31 }
 0x33c   :  { %v1195_v27 = vsel %vm1051_vm6, %v1182_v15, %v1194_v23 }
 0x33d   :  { %v1155_v12 = vpop.permute.xlu1 %1154 }
 0x33e   :  { %v1186_v18 = vrot.slane %v1155_v12, %v2622_v31 }
 0x340   :  { %v1196_v34 = vsel %vm1053_vm7, %v1186_v18, %v1195_v27 }
 0x341   :  { %v1158_v26 = vpop.permute.xlu1 %1157 }
 0x342   :  { %v1190_v29 = vrot.slane %v1158_v26, %v2622_v31 }
 0x344   :  { %v1197_v30 = vsel %vm1055_vm8, %v1190_v29, %v1196_v34 }
 0x345   :  { %v1199_v33 = vsel %vm1058_vm9, %v1197_v30, 0.0 }
 0x346   :  { %1200 = vadd.xlane.f32.xlu1 %v1199_v33 }
 0x3d3   :  { %v1201_v35 = vpop.xlane.xlu1 %1200 }
 0x3d4   :  { %v1206_v36 = vrot.slane %v1201_v35, %v2543_v58  ;;  %v1210_v52 = vrot.slane %v1201_v35, %v2549_v61  ;;  %v1214_v40 = vrot.slane %v1201_v35, %v2559_v20  ;;  %v1218_v41 = vrot.slane %v1201_v35, %v1077_v3 }
 0x3d5   :  { %v1222_v44 = vrot.slane %v1201_v35, %v1081_v10  ;;  %v1226_v58 = vrot.slane %v1201_v35, %v1085_v22  ;;  %v1230_v20 = vrot.slane %v1201_v35, %v1089_v28  ;;  %v1234_v10 = vrot.slane %v1201_v35, %v1093_v32 }
 0x3d6   :  { %2247 = vrcp.f32 %v1206_v36 }
 0x3d7   :  { %2249 = vrcp.f32 %v1210_v52 }
 0x3d8   :  { %2251 = vrcp.f32 %v1214_v40 }
 0x3d9   :  { %2253 = vrcp.f32 %v1218_v41 }
 0x3da   :  { %2255 = vrcp.f32 %v1222_v44 }
 0x3db   :  { %2257 = vrcp.f32 %v1226_v58 }
 0x3dc   :  { %2259 = vrcp.f32 %v1230_v20 }
 0x3dd   :  { %2261 = vrcp.f32 %v1234_v10 }
 0x3e0   :  { %v2248_v43 = vpop.eup %2247 }
 0x3e1   :  { %v1244_v47 = vmul.f32 %v2248_v43, %v2232_v38  ;;  %v2250_v54 = vpop.eup %2249 }
 0x3e2   :  { %v1246_v61 = vmul.f32 %v2250_v54, %v2658_v39  ;;  %v2252_v55 = vpop.eup %2251 }
 0x3e3   :  { %1261 = vperm.xlu0 %2156, %v1244_v47   ;;  %v1248_v3 = vmul.f32 %v2252_v55, %v2663_v42  ;;  %v2254_v59 = vpop.eup %2253 }
 0x3e4   :  { %v1250_v38 = vmul.f32 %v2254_v59, %v2666_v45  ;;  %v2256_v60 = vpop.eup %2255  ;;  %v2206_v45 = vld [vmem:[%s2842_s8 + $0x8] sm:$0xff]  }
 0x3e5   :  { %v1252_v22 = vmul.f32 %v2256_v60, %v2669_v49  ;;  %v2258_v39 = vpop.eup %2257  ;;  %2087 = vmatpush3.bf16.msra.mxu0 %v2206_v45  ;;  %v2207_v49 = vld [vmem:[%s2842_s8 + $0x10] sm:$0xff]  }
 0x3e6   :  { %v1254_v0 = vmul.f32 %v2258_v39, %v2672_v48  ;;  %v2260_v28 = vpop.eup %2259  ;;  %2088 = vmatprep.subr.bf16.mxu0 %v2301_v24  ;;  %v2208_v48 = vld [vmem:[%s2842_s8 + $0x18] sm:$0xff]  }
 0x3e7   :  { %1266 = vperm.xlu0 %2156, %v1246_v61   ;;  %v1256_v42 = vmul.f32 %v2260_v28, %v2675_v51  ;;  %v2262_v1 = vpop.eup %2261  ;;  %v2209_v51 = vld [vmem:[%s2842_s8 + $0x20] sm:$0xff]  }
 0x3e8   :  { %v1258_v32 = vmul.f32 %v2262_v1, %v2678_v53  ;;  %v2210_v53 = vld [vmem:[%s2842_s8 + $0x28] sm:$0xff]  }
 0x3e9   :  { %2089 = vmatpush3.bf16.msra.mxu0 %v2207_v49 }
 0x3ea   :  { %2090 = vmatprep.subr.bf16.mxu0 %v2301_v24 }
 0x3eb   :  { %1271 = vperm.xlu0 %2156, %v1248_v3  }
 0x3ed   :  { %2091 = vmatpush3.bf16.msra.mxu0 %v2208_v48 }
 0x3ee   :  { %2092 = vmatprep.subr.bf16.mxu0 %v2301_v24 }
 0x3ef   :  { %1276 = vperm.xlu0 %2156, %v1250_v38  }
 0x3f1   :  { %2093 = vmatpush3.bf16.msra.mxu0 %v2209_v51 }
 0x3f2   :  { %2094 = vmatprep.subr.bf16.mxu0 %v2301_v24 }
 0x3f3   :  { %1281 = vperm.xlu0 %2156, %v1252_v22  }
 0x3f5   :  { %2095 = vmatpush3.bf16.msra.mxu0 %v2210_v53 }
 0x3f6   :  { %2096 = vmatprep.subr.bf16.mxu0 %v2301_v24 }
 0x3f7   :  { %1286 = vperm.xlu0 %2156, %v1254_v0  }
 0x3f9   :  { %2097 = vmatpush3.bf16.msra.mxu0 %v2211_v2 }
 0x3fa   :  { %2098 = vmatprep.subr.bf16.mxu0 %v2301_v24 }
 0x3fb   :  { %1291 = vperm.xlu0 %2156, %v1256_v42  }
 0x3fd   :  { %2099 = vmatpush3.bf16.msra.mxu0 %v2212_v4 }
 0x3fe   :  { %2124 = vmatprep.subr.bf16.mxu0 %v2301_v24 }
 0x3ff   :  { %1296 = vperm.xlu0 %2156, %v1258_v32  }
 0x462   :  { %v1262_v6 = vpop.permute.xlu0 %1261 }
 0x463   :  { %v1299_v8 = vmul.f32 %v2000_v50, %v1262_v6  ;;  %v1729_v58 = vrot.slane %v1262_v6, %v2622_v31 }
 0x465   :  { %v1307_v13 = vrot.slane %v1299_v8, 4 }
 0x466   :  { %v1267_v9 = vpop.permute.xlu0 %1266 }
 0x467   :  { %v1300_v12 = vmul.f32 %v2001_v62, %v1267_v9  ;;  %v1308_v23 = vadd.f32 %v1307_v13, %v1299_v8  ;;  %v1733_v44 = vrot.slane %v1267_v9, %v2622_v31 }
 0x469   :  { %v1313_v15 = vrot.slane %v1300_v12, 4  ;;  %v1309_v50 = vrot.slane %v1308_v23, 2  ;;  %v1758_v38 = vsel %vm1043_vm2, %v1733_v44, %v1729_v58 }
 0x46a   :  { %v1272_v17 = vpop.permute.xlu0 %1271 }
 0x46b   :  { %v1301_v18 = vmul.f32 %v2004_v56, %v1272_v17  ;;  %v1314_v26 = vadd.f32 %v1313_v15, %v1300_v12  ;;  %v1310_v40 = vadd.f32 %v1309_v50, %v1308_v23  ;;  %v1737_v61 = vrot.slane %v1272_v17, %v2622_v31 }
 0x46d   :  { %v1319_v19 = vrot.slane %v1301_v18, 4  ;;  %v1315_v33 = vrot.slane %v1314_v26, 2  ;;  %v1311_v20 = vrot.slane %v1310_v40, 1  ;;  %v1759_v42 = vsel %vm1045_vm3, %v1737_v61, %v1758_v38 }
 0x46e   :  { %v1277_v27 = vpop.permute.xlu0 %1276 }
 0x46f   :  { %v1302_v29 = vmul.f32 %v2005_v7, %v1277_v27  ;;  %v1320_v34 = vadd.f32 %v1319_v19, %v1301_v18  ;;  %v1316_v56 = vadd.f32 %v1315_v33, %v1314_v26  ;;  %v1741_v3 = vrot.slane %v1277_v27, %v2622_v31 }
 0x470   :  { %v1312_v45 = vadd.f32 %v1311_v20, %v1310_v40 }
 0x471   :  { %v1325_v30 = vrot.slane %v1302_v29, 4  ;;  %v1321_v62 = vrot.slane %v1320_v34, 2  ;;  %v1760_v48 = vsel %vm1047_vm4, %v1741_v3, %v1759_v42  ;;  %v2219_v42 = vld [vmem:[%s2843_s9 + $0x30] sm:$0xff]  }
 0x472   :  { %v1282_v35 = vpop.permute.xlu0 %1281 }
 0x473   :  { %v1326_v46 = vadd.f32 %v1325_v30, %v1302_v29  ;;  %v1303_v36 = vmul.f32 %v2008_v11, %v1282_v35  ;;  %v1322_v7 = vadd.f32 %v1321_v62, %v1320_v34  ;;  %v1317_v11 = vrot.slane %v1316_v56, 1 }
 0x474   :  { %v1745_v60 = vrot.slane %v1282_v35, %v2622_v31 }
 0x475   :  { %v1327_v52 = vrot.slane %v1326_v46, 2  ;;  %v1331_v41 = vrot.slane %v1303_v36, 4  ;;  %v1323_v22 = vrot.slane %v1322_v7, 1  ;;  %v1318_v49 = vadd.f32 %v1317_v11, %v1316_v56 }
 0x476   :  { %v1287_v43 = vpop.permute.xlu0 %1286  ;;  %v1761_v2 = vsel %vm1049_vm5, %v1745_v60, %v1760_v48  ;;  %v2213_v60 = vld [vmem:[%s2843_s9] sm:$0xff]  }
 0x477   :  { %v1304_v37 = vmul.f32 %v2009_v16, %v1287_v43  ;;  %v1328_v47 = vadd.f32 %v1327_v52, %v1326_v46  ;;  %v1332_v54 = vadd.f32 %v1331_v41, %v1303_v36  ;;  %v1749_v28 = vrot.slane %v1287_v43, %v2622_v31 }
 0x478   :  { %v1324_v8 = vadd.f32 %v1323_v22, %v1322_v7  ;;  %v1373_v27 = vpack.c.bf16 %v1318_v49, %v1318_v49  ;;  %v2215_v22 = vld [vmem:[%s2843_s9 + $0x10] sm:$0xff]  }
 0x479   :  { %v1337_v55 = vrot.slane %v1304_v37, 4  ;;  %v1333_v59 = vrot.slane %v1332_v54, 2  ;;  %v1329_v39 = vrot.slane %v1328_v47, 1  ;;  %v1762_v12 = vsel %vm1051_vm6, %v1749_v28, %v1761_v2  ;;  %v2218_v28 = vld [vmem:[%s2843_s9 + $0x28] sm:$0xff]  }
 0x47a   :  { %v1292_v10 = vpop.permute.xlu0 %1291  ;;  %v1374_v14 = vpack.c.bf16 %v1324_v8, %v1324_v8  ;;  %v1405_v46 = vunpack.c.l.b16 %v1373_v27 }
 0x47b   :  { %v1338_v5 = vadd.f32 %v1337_v55, %v1304_v37  ;;  %v1305_v16 = vmul.f32 %v2012_v21, %v1292_v10  ;;  %v1334_v0 = vadd.f32 %v1333_v59, %v1332_v54  ;;  %v1753_v32 = vrot.slane %v1292_v10, %v2622_v31 }
 0x47c   :  { %v1330_v9 = vadd.f32 %v1329_v39, %v1328_v47  ;;  %v1406_v40 = vunpack.c.l.b16 %v1374_v14  ;;  %v2216_v39 = vld [vmem:[%s2843_s9 + $0x18] sm:$0xff]  }
 0x47d   :  { %v1339_v1 = vrot.slane %v1338_v5, 2  ;;  %v1343_v57 = vrot.slane %v1305_v16, 4  ;;  %v1335_v51 = vrot.slane %v1334_v0, 1  ;;  %v1763_v18 = vsel %vm1053_vm7, %v1753_v32, %v1762_v12  ;;  %v1980_v32 = vld [vmem:[%s2840_s6 + $0x2] ss:$0 sm:$0xff] }
 0x47e   :  { %v1297_v53 = vpop.permute.xlu0 %1296 }
 0x47f   :  { %v1340_v21 = vadd.f32 %v1339_v1, %v1338_v5  ;;  %v1344_v4 = vadd.f32 %v1343_v57, %v1305_v16  ;;  %v1306_v6 = vmul.f32 %v2013_v25, %v1297_v53  ;;  %v1757_v13 = vrot.slane %v1297_v53, %v2622_v31  ;;  %v2214_v16 = vld [vmem:[%s2843_s9 + $0x8] sm:$0xff]   ;;  %v2220_v1 = vld [vmem:[%s2843_s9 + $0x38] sm:$0xff]  }
 0x480   :  { %v1336_v23 = vadd.f32 %v1335_v51, %v1334_v0  ;;  %v1372_v25 = vpack.c.bf16 %v1312_v45, %v1312_v45  ;;  %v1375_v31 = vpack.c.bf16 %v1330_v9, %v1330_v9  ;;  %v2217_v0 = vld [vmem:[%s2843_s9 + $0x20] sm:$0xff]  }
 0x481   :  { %v1341_v15 = vrot.slane %v1340_v21, 1  ;;  %v1345_v17 = vrot.slane %v1344_v4, 2  ;;  %v1349_v19 = vrot.slane %v1306_v6, 4  ;;  %v1764_v26 = vsel %vm1055_vm8, %v1757_v13, %v1763_v18 }
 0x482   :  { %1766 = vst.msk [vmem:[%s2844_s10 + $0x10] sm:$0xff] %vm1058_vm9, %v1764_v26  ;;  %v1376_v35 = vpack.c.bf16 %v1336_v23, %v1336_v23  ;;  %v1404_v56 = vunpack.c.l.b16 %v1372_v25  ;;  %v1407_v41 = vunpack.c.l.b16 %v1375_v31 }
 0x483   :  { %v1342_v29 = vadd.f32 %v1341_v15, %v1340_v21  ;;  %v1346_v34 = vadd.f32 %v1345_v17, %v1344_v4  ;;  %v1350_v30 = vadd.f32 %v1349_v19, %v1306_v6 }
 0x484   :  { %v1408_v37 = vunpack.c.l.b16 %v1376_v35  ;;  %v1412_v7 = vsel %vm1043_vm2, %v1405_v46, %v1404_v56 }
 0x485   :  { %v1347_v50 = vrot.slane %v1346_v34, 1  ;;  %v1351_v33 = vrot.slane %v1350_v30, 2  ;;  %v1377_v62 = vpack.c.bf16 %v1342_v29, %v1342_v29  ;;  %v1413_v58 = vsel %vm1045_vm3, %v1406_v40, %v1412_v7 }
 0x486   :  { %v1414_v55 = vsel %vm1047_vm4, %v1407_v41, %v1413_v58 }
 0x487   :  { %v1348_v36 = vadd.f32 %v1347_v50, %v1346_v34  ;;  %v1352_v52 = vadd.f32 %v1351_v33, %v1350_v30  ;;  %v1409_v47 = vunpack.c.l.b16 %v1377_v62  ;;  %v1415_v11 = vsel %vm1049_vm5, %v1408_v37, %v1414_v55 }
 0x489   :  { %v1378_v43 = vpack.c.bf16 %v1348_v36, %v1348_v36  ;;  %v1353_v44 = vrot.slane %v1352_v52, 1  ;;  %v1416_v59 = vsel %vm1051_vm6, %v1409_v47, %v1415_v11 }
 0x48b   :  { %v1354_v54 = vadd.f32 %v1353_v44, %v1352_v52  ;;  %v1410_v61 = vunpack.c.l.b16 %v1378_v43 }
 0x48d   :  { %v1379_v20 = vpack.c.bf16 %v1354_v54, %v1354_v54  ;;  %v1417_v10 = vsel %vm1053_vm7, %v1410_v61, %v1416_v59 }
 0x48f   :  { %v1411_v3 = vunpack.c.l.b16 %v1379_v20 }
 0x491   :  { %v1418_v38 = vsel %vm1055_vm8, %v1411_v3, %v1417_v10 }
 0x492   :  { %v1419_v5 = vpack.c.b16 %v1418_v38, %v1418_v38 }
 0x494   :  { %2101 = vmatmul.mubr.bf16.vlgmr.msra.gmra.mrb[4].mxu0 %v1419_v5 }
 0x495   :  { %2125 = vmatpush3.bf16.msra.mxu0 %v2213_v60  ;;  %2140 = vmatprep.mubr.msk.bf16.mxu0 %vm2302_vm1, %v2301_v24 }
 0x496   :  { %2126 = vmatprep.subr.bf16.mxu0 %v2301_v24 }
 0x499   :  { %2127 = vmatpush3.bf16.msra.mxu0 %v2214_v16 }
 0x49a   :  { %2128 = vmatprep.subr.bf16.mxu0 %v2301_v24 }
 0x49d   :  { %2129 = vmatpush3.bf16.msra.mxu0 %v2215_v22 }
 0x49e   :  { %2130 = vmatprep.subr.bf16.mxu0 %v2301_v24 }
 0x4a1   :  { %2131 = vmatpush3.bf16.msra.mxu0 %v2216_v39 }
 0x4a2   :  { %2132 = vmatprep.subr.bf16.mxu0 %v2301_v24 }
 0x4a5   :  { %2133 = vmatpush3.bf16.msra.mxu0 %v2217_v0 }
 0x4a6   :  { %2134 = vmatprep.subr.bf16.mxu0 %v2301_v24 }
 0x4a9   :  { %2135 = vmatpush3.bf16.msra.mxu0 %v2218_v28 }
 0x4aa   :  { %2136 = vmatprep.subr.bf16.mxu0 %v2301_v24 }
 0x4ad   :  { %2137 = vmatpush3.bf16.msra.mxu0 %v2219_v42 }
 0x4ae   :  { %2138 = vmatprep.subr.bf16.mxu0 %v2301_v24  ;;  %v1981_v24 = vld [vmem:[%s2840_s6 + $0x3] ss:$0 sm:$0xff] }
 0x4b1   :  { %2139 = vmatpush3.bf16.msra.mxu0 %v2220_v1 }
 0x567   :  { %v1503_v57 = vpop.f32.mrb[4].mxu0 }
 0x568   :  { %v1592_v45 = vadd.f32 %v2640_v63, %v1503_v57  ;;  %v2102_v49 = vpop.f32.mrb[5].mxu0 }
 0x569   :  { %v1506_v48 = vpop.f32.mrb[6].mxu0 }
 0x56a   :  { %v1602_v51 = vadd.f32 %v1980_v32, %v1592_v45  ;;  %v2103_v53 = vpop.f32.mrb[7].mxu0 }
 0x56c   :  { %2263 = vtanh.f32 %v1602_v51 }
 0x576   :  { %v2264_v2 = vpop.eup %2263 }
 0x577   :  { %v1604_v21 = vpack.c.bf16 %v2264_v2, %v2264_v2 }
 0x579   :  { %2141 = vmatmul.mubr.bf16.vlgmr.msra.gmra.mrb[8].mxu0 %v1604_v21 }
 0x64c   :  { %v1708_v4 = vpop.f32.mrb[8].mxu0 }
 0x64d   :  { %v1709_v6 = vadd.f32 %v1981_v24, %v1708_v4  ;;  %v2142_v8 = vpop.f32.mrb[9].mxu0 }
 0x64e   :  { %v1711_v9 = vpop.f32.mrb[10].mxu0 }
 0x64f   :  { %1714 = vmax.xlane.f32.xlu1 %v1709_v6  ;;  %v2143_v12 = vpop.f32.mrb[11].mxu0 }
 0x6dc   :  { %v1715_v13 = vpop.xlane.xlu1 %1714 }
 0x6dd   :  { %v1716_v63 = vsub.f32 %v1709_v6, %v1715_v13 }
 0x6df   :  { %v1717_v15 = vmul.f32 1.442695, %v1716_v63 }
 0x6e1   :  { %2265 = vpow2.f32 %v1717_v15 }
 0x6eb   :  { %v2266_v17 = vpop.eup %2265 }
 0x6ec   :  { %1719 = vadd.xlane.f32.xlu0 %v2266_v17 }
 0x779   :  { %v1720_v18 = vpop.xlane.xlu0 %1719 }
 0x77a   :  { %2267 = vlog2.f32 %v1720_v18 }
 0x784   :  { %v2268_v19 = vpop.eup %2267 }
 0x785   :  { %v1722_v23 = vmul.f32 0.6931472, %v2268_v19 }
 0x787   :  { %v1723_v26 = vsub.f32 %v1716_v63, %v1722_v23 }
 0x789   :  { %1724 = vst [vmem:[%s2844_s10] sm:$0xff] %v1723_v26 }
 0x78a   :  { %1771 = vsyncpa [#allocation5], 1 }
 0x78b   :  { %1772 = vsyncmov [#allocation3] }
 0x78e   :  { %s1773_s6 = vpop.sfrf %1772 }
 0x78f   :  { %p1990_p5 = scmp.ne.s32.totalorder %s1773_s6, 0 }
 0x791   :  { %1777 = shalt.err (%p1990_p5)  }
 0x792   :  { %1779 = vsyncmov [#allocation3 + $0x1] }
 0x795   :  { %s1780_s13 = vpop.sfrf %1779 }
 0x796   :  { %p1991_p6 = scmp.ne.s32.totalorder %s1780_s13, 0 }
 0x798   :  { %1784 = shalt.err (%p1991_p6)  }
 0x799   :  { %1786 = vsyncmov [#allocation3 + $0x2] }
 0x79c   :  { %s1787_s14 = vpop.sfrf %1786 }
 0x79d   :  { %p1992_p7 = scmp.ne.s32.totalorder %s1787_s14, 0 }
 0x79f   :  { %1791 = shalt.err (%p1992_p7)  }
 0x7a0   :  { %1793 = vsyncmov [#allocation3 + $0x3] }
 0x7a3   :  { %s1794_s15 = vpop.sfrf %1793 }
 0x7a4   :  { %p1993_p8 = scmp.ne.s32.totalorder %s1794_s15, 0 }
 0x7a6   :  { %1798 = shalt.err (%p1993_p8)  }
 0x7a7   :  { %1800 = vsyncmov [#allocation3 + $0x4] }
 0x7aa   :  { %s1801_s16 = vpop.sfrf %1800 }
 0x7ab   :  { %p1994_p9 = scmp.ne.s32.totalorder %s1801_s16, 0 }
 0x7ad   :  { %1805 = shalt.err (%p1994_p9)  }
 0x7ae   :  { %1807 = vsyncmov [#allocation3 + $0x5] }
 0x7b1   :  { %s1808_s10 = vpop.sfrf %1807 }
 0x7b2   :  { %p1995_p10 = scmp.ne.s32.totalorder %s1808_s10, 0 }
 0x7b4   :  { %1812 = shalt.err (%p1995_p10)  }
 0x7b5   :  { %1814 = vsyncmov [#allocation3 + $0x6] }
 0x7b8   :  { %s1815_s7 = vpop.sfrf %1814 }
 0x7b9   :  { %p1996_p11 = scmp.ne.s32.totalorder %s1815_s7, 0 }
 0x7bb   :  { %1819 = shalt.err (%p1996_p11)  }
 0x7bc   :  { %1821 = vsyncmov [#allocation3 + $0x7] }
 0x7bf   :  { %s1822_s8 = vpop.sfrf %1821 }
 0x7c0   :  { %p1997_p12 = scmp.ne.s32.totalorder %s1822_s8, 0 }
 0x7c2   :  { %1826 = shalt.err (%p1997_p12)  }

</bundles_post_ra>
